<compile_context>
chip_gen: v7x
topology: tpu7x:2x2x1
jax: 0.10.0
libtpu: 0.0.40
codegen_flags: <defaults>
</compile_context>

<pallas_src>
import jax
import jax.numpy as jnp
from jax import lax
from jax.experimental import pallas as pl
from jax.experimental.pallas import tpu as pltpu

NEG_SLOPE = 0.01   # F.leaky_relu default
BN_EPS = 1e-5      # nn.BatchNorm1d default


def _lstm_cls_kernel(x2d_ref,                       # (T*B, D)  time-major rows
                     wih_f_ref, whh_f_ref, b_f_ref,  # (4,D,H) (4,H,H) (4,1,H)
                     wih_b_ref, b_b_ref,             # (3,D,H) (3,1,H)  [i,g,o]
                     w1_f_ref, w1_b_ref, b1_ref,     # (H,hid) (H,hid) (1,hid)
                     w2_ref, b2_ref,                 # (hid,C) (1,C)   BN-folded
                     out_ref):                       # (B, C)
    TB, _ = x2d_ref.shape
    H = whh_f_ref.shape[1]
    B = out_ref.shape[0]
    T = TB // B

    x2d = x2d_ref[...]

    # ---- hoisted input projection: one matmul per gate over ALL timesteps ----
    # zx[k][t*B:(t+1)*B] == x[:, t, :] @ W_ih_k + (b_ih_k + b_hh_k)
    zx = [jnp.dot(x2d, wih_f_ref[k], preferred_element_type=jnp.float32)
          + b_f_ref[k]
          for k in range(4)]

    whh_i = whh_f_ref[0]
    whh_f = whh_f_ref[1]
    whh_g = whh_f_ref[2]
    whh_o = whh_f_ref[3]

    h = jnp.zeros((B, H), jnp.float32)
    c = jnp.zeros((B, H), jnp.float32)

    # ---- fully-unrolled recurrence: only h @ W_hh_* on the serial chain ----
    for t in range(T):
        lo = t * B
        zi = zx[0][lo:lo + B] + jnp.dot(h, whh_i, preferred_element_type=jnp.float32)
        zf = zx[1][lo:lo + B] + jnp.dot(h, whh_f, preferred_element_type=jnp.float32)
        zg = zx[2][lo:lo + B] + jnp.dot(h, whh_g, preferred_element_type=jnp.float32)
        zo = zx[3][lo:lo + B] + jnp.dot(h, whh_o, preferred_element_type=jnp.float32)
        i = jax.nn.sigmoid(zi)
        f = jax.nn.sigmoid(zf)
        g = jnp.tanh(zg)
        o = jax.nn.sigmoid(zo)
        c = f * c + i * g
        h = o * jnp.tanh(c)
    h_fwd = h

    # ---- backward direction at the last time index: one step, zero state ----
    x_last = x2d[(T - 1) * B:, :]                                   # (B, D)
    zbi = jnp.dot(x_last, wih_b_ref[0], preferred_element_type=jnp.float32) + b_b_ref[0]
    zbg = jnp.dot(x_last, wih_b_ref[1], preferred_element_type=jnp.float32) + b_b_ref[1]
    zbo = jnp.dot(x_last, wih_b_ref[2], preferred_element_type=jnp.float32) + b_b_ref[2]
    c_b = jax.nn.sigmoid(zbi) * jnp.tanh(zbg)
    h_bwd = jax.nn.sigmoid(zbo) * jnp.tanh(c_b)

    # ---- dense1 over concat([h_fwd, h_bwd]) as a split matmul + leaky_relu ----
    z1 = (jnp.dot(h_fwd, w1_f_ref[...], preferred_element_type=jnp.float32)
          + jnp.dot(h_bwd, w1_b_ref[...], preferred_element_type=jnp.float32)
          + b1_ref[...])
    z1 = jnp.where(z1 > 0, z1, NEG_SLOPE * z1)

    # ---- output layer (BatchNorm already folded into w2/b2); dropout = id ----
    out_ref[...] = (jnp.dot(z1, w2_ref[...], preferred_element_type=jnp.float32)
                    + b2_ref[...])


def pure_lstm_classifier(x_deep, p):
    """x_deep: (B, T, D) float32. p: dict of params in PyTorch layout."""
    B, T, D = x_deep.shape
    H = p["w_hh_f"].shape[1]          # lstm_units
    hidden = p["w1"].shape[0]
    C = p["w2"].shape[0]

    # time-major, flattened: row t*B + b  <->  x_deep[b, t, :]
    x2d = jnp.transpose(x_deep, (1, 0, 2)).reshape(T * B, D).astype(jnp.float32)

    def split_gates(w):               # (4H, X) -> (4, X, H), gate order [i,f,g,o]
        return jnp.stack([w[k * H:(k + 1) * H].T for k in range(4)], axis=0)

    def split_bias(b):                # (4H,) -> (4, 1, H)
        return jnp.stack([b[k * H:(k + 1) * H].reshape(1, H) for k in range(4)], axis=0)

    # forward direction: per-gate weights, biases (b_ih + b_hh) pre-summed
    wih_f = split_gates(p["w_ih_f"])                              # (4, D, H)
    whh_f = split_gates(p["w_hh_f"])                              # (4, H, H)
    b_f = split_bias(p["b_ih_f"] + p["b_hh_f"])                   # (4, 1, H)

    # backward direction needs only i, g, o (zero initial state; W_hh_b unused)
    wih_b_all = split_gates(p["w_ih_b"])
    b_b_all = split_bias(p["b_ih_b"] + p["b_hh_b"])
    bwd = (0, 2, 3)                                               # i, g, o
    wih_b = jnp.stack([wih_b_all[k] for k in bwd], axis=0)        # (3, D, H)
    b_b = jnp.stack([b_b_all[k] for k in bwd], axis=0)            # (3, 1, H)

    # dense1 split into forward/backward halves of the concat
    w1t = p["w1"].T                                               # (2H, hidden)
    w1_f, w1_b = w1t[:H], w1t[H:]
    b1 = p["b1"].reshape(1, hidden)

    # fold eval-mode BatchNorm1d into the output layer (exact affine fold)
    scale = p["gamma"] / jnp.sqrt(p["running_var"] + BN_EPS)
    shift = p["beta"] - p["running_mean"] * scale
    w2t = p["w2"].T                                               # (hidden, C)
    w2 = scale[:, None] * w2t
    b2 = (shift @ w2t + p["b2"]).reshape(1, C)

    args = (x2d, wih_f, whh_f, b_f, wih_b, b_b, w1_f, w1_b, b1, w2, b2)
    vmem = pl.BlockSpec(memory_space=pltpu.MemorySpace.VMEM)

    # Gridless: all operands are tiny and fully VMEM-resident.
    # TODO(synk): at production B, add a batch grid with
    # dimension_semantics=("parallel",) (v7x 2-TC) and stream x via BlockSpec.
    return pl.pallas_call(
        _lstm_cls_kernel,
        out_shape=jax.ShapeDtypeStruct((B, C), jnp.float32),
        in_specs=[vmem] * len(args),
        out_specs=vmem,
    )(*args)


def _reference_forward(x_deep, p):
    """Pure-JAX reference (same eval-mode semantics) for a sanity check."""
    B, T, D = x_deep.shape
    H = p["w_hh_f"].shape[1]

    def cell(xt, h, c, w_ih, w_hh, b_ih, b_hh):
        z = xt @ w_ih.T + h @ w_hh.T + b_ih + b_hh
        i = jax.nn.sigmoid(z[:, 0:H])
        f = jax.nn.sigmoid(z[:, H:2 * H])
        g = jnp.tanh(z[:, 2 * H:3 * H])
        o = jax.nn.sigmoid(z[:, 3 * H:4 * H])
        c = f * c + i * g
        return o * jnp.tanh(c), c

    h = jnp.zeros((B, H)); c = jnp.zeros((B, H))
    for t in range(T):
        h, c = cell(x_deep[:, t, :], h, c,
                    p["w_ih_f"], p["w_hh_f"], p["b_ih_f"], p["b_hh_f"])
    hb, _ = cell(x_deep[:, -1, :], jnp.zeros((B, H)), jnp.zeros((B, H)),
                 p["w_ih_b"], p["w_hh_b"], p["b_ih_b"], p["b_hh_b"])
    last = jnp.concatenate([h, hb], axis=-1)
    z = last @ p["w1"].T + p["b1"]
    z = jnp.where(z > 0, z, NEG_SLOPE * z)
    z = (z - p["running_mean"]) / jnp.sqrt(p["running_var"] + BN_EPS) * p["gamma"] + p["beta"]
    return z @ p["w2"].T + p["b2"]


def init_params(key, deep_features, lstm_units=16, hidden_size=32, num_classes=3):
    ks = jax.random.split(key, 12)
    H, D = lstm_units, deep_features

    def unif(k, shape, bound):
        return jax.random.uniform(k, shape, jnp.float32, -bound, bound)

    kl = 1.0 / jnp.sqrt(H)
    p = {
        "w_ih_f": unif(ks[0], (4 * H, D), kl), "w_hh_f": unif(ks[1], (4 * H, H), kl),
        "b_ih_f": unif(ks[2], (4 * H,), kl),  "b_hh_f": unif(ks[3], (4 * H,), kl),
        "w_ih_b": unif(ks[4], (4 * H, D), kl), "w_hh_b": unif(ks[5], (4 * H, H), kl),
        "b_ih_b": unif(ks[6], (4 * H,), kl),  "b_hh_b": unif(ks[7], (4 * H,), kl),
        "w1": unif(ks[8], (hidden_size, 2 * H), 1.0 / jnp.sqrt(2 * H)),
        "b1": unif(ks[9], (hidden_size,), 1.0 / jnp.sqrt(2 * H)),
        "gamma": jnp.ones((hidden_size,), jnp.float32),
        "beta": jnp.zeros((hidden_size,), jnp.float32),
        "running_mean": jnp.zeros((hidden_size,), jnp.float32),
        "running_var": jnp.ones((hidden_size,), jnp.float32),
        "w2": unif(ks[10], (num_classes, hidden_size), 1.0 / jnp.sqrt(hidden_size)),
        "b2": unif(ks[11], (num_classes,), 1.0 / jnp.sqrt(hidden_size)),
    }
    return p


if __name__ == "__main__":
    B, T, D = 2, 8, 16              # batch, time_steps, deep_features
    lstm_units, hidden, classes = 16, 32, 3

    key = jax.random.PRNGKey(0)
    k_x, k_p = jax.random.split(key)
    x_deep = jax.random.normal(k_x, (B, T, D), jnp.float32)
    params = init_params(k_p, D, lstm_units, hidden, classes)

    out = pure_lstm_classifier(x_deep, params)
    out = jax.block_until_ready(out)

    ref = _reference_forward(x_deep, params)
    assert out.shape == (B, classes)
    assert jnp.allclose(out, ref, rtol=1e-4, atol=1e-5), "mismatch vs JAX reference"

    print("KERNEL_OK")
</pallas_src>

<mosaic_0001>
module attributes {stable_mosaic.version = 11 : i64} {
  func.func @_lstm_cls_kernel(%arg0: memref<16x16xf32, #tpu.memory_space<vmem>>, %arg1: memref<4x16x16xf32, #tpu.memory_space<vmem>>, %arg2: memref<4x16x16xf32, #tpu.memory_space<vmem>>, %arg3: memref<4x1x16xf32, #tpu.memory_space<vmem>>, %arg4: memref<3x16x16xf32, #tpu.memory_space<vmem>>, %arg5: memref<3x1x16xf32, #tpu.memory_space<vmem>>, %arg6: memref<16x32xf32, #tpu.memory_space<vmem>>, %arg7: memref<16x32xf32, #tpu.memory_space<vmem>>, %arg8: memref<1x32xf32, #tpu.memory_space<vmem>>, %arg9: memref<32x3xf32, #tpu.memory_space<vmem>>, %arg10: memref<1x3xf32, #tpu.memory_space<vmem>>, %arg11: memref<2x3xf32, #tpu.memory_space<vmem>>) attributes {dimension_semantics = [], scalar_prefetch = 0 : i64, scratch_operands = 0 : i64, tpu.core_type = #tpu.core_type<tc>} {
    %c0 = arith.constant 0 : index
    %c0_0 = arith.constant 0 : index
    %0 = vector.load %arg0[%c0, %c0_0] : memref<16x16xf32, #tpu.memory_space<vmem>>, vector<16x16xf32>
    %c0_1 = arith.constant 0 : index
    %c0_2 = arith.constant 0 : index
    %c0_3 = arith.constant 0 : index
    %1 = vector.load %arg1[%c0_1, %c0_2, %c0_3] : memref<4x16x16xf32, #tpu.memory_space<vmem>>, vector<1x16x16xf32>
    %2 = vector.shape_cast %1 : vector<1x16x16xf32> to vector<16x16xf32>
    %cst = arith.constant dense<0.000000e+00> : vector<16x16xf32>
    %3 = tpu.matmul %0, %2, %cst {dimension_numbers = #tpu.dot_dimension_numbers<[1], [0], [0], [1], [0, 0, 1, 1], [], []>} : vector<16x16xf32>, vector<16x16xf32>, vector<16x16xf32> -> vector<16x16xf32>
    %c0_4 = arith.constant 0 : index
    %c0_5 = arith.constant 0 : index
    %c0_6 = arith.constant 0 : index
    %4 = vector.load %arg3[%c0_4, %c0_5, %c0_6] : memref<4x1x16xf32, #tpu.memory_space<vmem>>, vector<1x1x16xf32>
    %5 = vector.shape_cast %4 : vector<1x1x16xf32> to vector<1x16xf32>
    %6 = vector.broadcast %5 : vector<1x16xf32> to vector<16x16xf32>
    %7 = arith.addf %3, %6 : vector<16x16xf32>
    %c1 = arith.constant 1 : index
    %c0_7 = arith.constant 0 : index
    %c0_8 = arith.constant 0 : index
    %8 = vector.load %arg1[%c1, %c0_7, %c0_8] : memref<4x16x16xf32, #tpu.memory_space<vmem>>, vector<1x16x16xf32>
    %9 = vector.shape_cast %8 : vector<1x16x16xf32> to vector<16x16xf32>
    %cst_9 = arith.constant dense<0.000000e+00> : vector<16x16xf32>
    %10 = tpu.matmul %0, %9, %cst_9 {dimension_numbers = #tpu.dot_dimension_numbers<[1], [0], [0], [1], [0, 0, 1, 1], [], []>} : vector<16x16xf32>, vector<16x16xf32>, vector<16x16xf32> -> vector<16x16xf32>
    %c1_10 = arith.constant 1 : index
    %c0_11 = arith.constant 0 : index
    %c0_12 = arith.constant 0 : index
    %11 = vector.load %arg3[%c1_10, %c0_11, %c0_12] : memref<4x1x16xf32, #tpu.memory_space<vmem>>, vector<1x1x16xf32>
    %12 = vector.shape_cast %11 : vector<1x1x16xf32> to vector<1x16xf32>
    %13 = vector.broadcast %12 : vector<1x16xf32> to vector<16x16xf32>
    %14 = arith.addf %10, %13 : vector<16x16xf32>
    %c2 = arith.constant 2 : index
    %c0_13 = arith.constant 0 : index
    %c0_14 = arith.constant 0 : index
    %15 = vector.load %arg1[%c2, %c0_13, %c0_14] : memref<4x16x16xf32, #tpu.memory_space<vmem>>, vector<1x16x16xf32>
    %16 = vector.shape_cast %15 : vector<1x16x16xf32> to vector<16x16xf32>
    %cst_15 = arith.constant dense<0.000000e+00> : vector<16x16xf32>
    %17 = tpu.matmul %0, %16, %cst_15 {dimension_numbers = #tpu.dot_dimension_numbers<[1], [0], [0], [1], [0, 0, 1, 1], [], []>} : vector<16x16xf32>, vector<16x16xf32>, vector<16x16xf32> -> vector<16x16xf32>
    %c2_16 = arith.constant 2 : index
    %c0_17 = arith.constant 0 : index
    %c0_18 = arith.constant 0 : index
    %18 = vector.load %arg3[%c2_16, %c0_17, %c0_18] : memref<4x1x16xf32, #tpu.memory_space<vmem>>, vector<1x1x16xf32>
    %19 = vector.shape_cast %18 : vector<1x1x16xf32> to vector<1x16xf32>
    %20 = vector.broadcast %19 : vector<1x16xf32> to vector<16x16xf32>
    %21 = arith.addf %17, %20 : vector<16x16xf32>
    %c3 = arith.constant 3 : index
    %c0_19 = arith.constant 0 : index
    %c0_20 = arith.constant 0 : index
    %22 = vector.load %arg1[%c3, %c0_19, %c0_20] : memref<4x16x16xf32, #tpu.memory_space<vmem>>, vector<1x16x16xf32>
    %23 = vector.shape_cast %22 : vector<1x16x16xf32> to vector<16x16xf32>
    %cst_21 = arith.constant dense<0.000000e+00> : vector<16x16xf32>
    %24 = tpu.matmul %0, %23, %cst_21 {dimension_numbers = #tpu.dot_dimension_numbers<[1], [0], [0], [1], [0, 0, 1, 1], [], []>} : vector<16x16xf32>, vector<16x16xf32>, vector<16x16xf32> -> vector<16x16xf32>
    %c3_22 = arith.constant 3 : index
    %c0_23 = arith.constant 0 : index
    %c0_24 = arith.constant 0 : index
    %25 = vector.load %arg3[%c3_22, %c0_23, %c0_24] : memref<4x1x16xf32, #tpu.memory_space<vmem>>, vector<1x1x16xf32>
    %26 = vector.shape_cast %25 : vector<1x1x16xf32> to vector<1x16xf32>
    %27 = vector.broadcast %26 : vector<1x16xf32> to vector<16x16xf32>
    %28 = arith.addf %24, %27 : vector<16x16xf32>
    %c0_25 = arith.constant 0 : index
    %c0_26 = arith.constant 0 : index
    %c0_27 = arith.constant 0 : index
    %29 = vector.load %arg2[%c0_25, %c0_26, %c0_27] : memref<4x16x16xf32, #tpu.memory_space<vmem>>, vector<1x16x16xf32>
    %30 = vector.shape_cast %29 : vector<1x16x16xf32> to vector<16x16xf32>
    %c1_28 = arith.constant 1 : index
    %c0_29 = arith.constant 0 : index
    %c0_30 = arith.constant 0 : index
    %31 = vector.load %arg2[%c1_28, %c0_29, %c0_30] : memref<4x16x16xf32, #tpu.memory_space<vmem>>, vector<1x16x16xf32>
    %32 = vector.shape_cast %31 : vector<1x16x16xf32> to vector<16x16xf32>
    %c2_31 = arith.constant 2 : index
    %c0_32 = arith.constant 0 : index
    %c0_33 = arith.constant 0 : index
    %33 = vector.load %arg2[%c2_31, %c0_32, %c0_33] : memref<4x16x16xf32, #tpu.memory_space<vmem>>, vector<1x16x16xf32>
    %34 = vector.shape_cast %33 : vector<1x16x16xf32> to vector<16x16xf32>
    %c3_34 = arith.constant 3 : index
    %c0_35 = arith.constant 0 : index
    %c0_36 = arith.constant 0 : index
    %35 = vector.load %arg2[%c3_34, %c0_35, %c0_36] : memref<4x16x16xf32, #tpu.memory_space<vmem>>, vector<1x16x16xf32>
    %36 = vector.shape_cast %35 : vector<1x16x16xf32> to vector<16x16xf32>
    %cst_37 = arith.constant 0.000000e+00 : f32
    %37 = vector.broadcast %cst_37 : f32 to vector<2x16xf32>
    %cst_38 = arith.constant 0.000000e+00 : f32
    %38 = vector.broadcast %cst_38 : f32 to vector<2x16xf32>
    %39 = vector.extract_strided_slice %7 {offsets = [0, 0], sizes = [2, 16], strides = [1, 1]} : vector<16x16xf32> to vector<2x16xf32>
    %cst_39 = arith.constant dense<0.000000e+00> : vector<2x16xf32>
    %40 = tpu.matmul %37, %30, %cst_39 {dimension_numbers = #tpu.dot_dimension_numbers<[1], [0], [0], [1], [0, 0, 1, 1], [], []>} : vector<2x16xf32>, vector<16x16xf32>, vector<2x16xf32> -> vector<2x16xf32>
    %41 = arith.addf %39, %40 : vector<2x16xf32>
    %42 = vector.extract_strided_slice %14 {offsets = [0, 0], sizes = [2, 16], strides = [1, 1]} : vector<16x16xf32> to vector<2x16xf32>
    %cst_40 = arith.constant dense<0.000000e+00> : vector<2x16xf32>
    %43 = tpu.matmul %37, %32, %cst_40 {dimension_numbers = #tpu.dot_dimension_numbers<[1], [0], [0], [1], [0, 0, 1, 1], [], []>} : vector<2x16xf32>, vector<16x16xf32>, vector<2x16xf32> -> vector<2x16xf32>
    %44 = arith.addf %42, %43 : vector<2x16xf32>
    %45 = vector.extract_strided_slice %21 {offsets = [0, 0], sizes = [2, 16], strides = [1, 1]} : vector<16x16xf32> to vector<2x16xf32>
    %cst_41 = arith.constant dense<0.000000e+00> : vector<2x16xf32>
    %46 = tpu.matmul %37, %34, %cst_41 {dimension_numbers = #tpu.dot_dimension_numbers<[1], [0], [0], [1], [0, 0, 1, 1], [], []>} : vector<2x16xf32>, vector<16x16xf32>, vector<2x16xf32> -> vector<2x16xf32>
    %47 = arith.addf %45, %46 : vector<2x16xf32>
    %48 = vector.extract_strided_slice %28 {offsets = [0, 0], sizes = [2, 16], strides = [1, 1]} : vector<16x16xf32> to vector<2x16xf32>
    %cst_42 = arith.constant dense<0.000000e+00> : vector<2x16xf32>
    %49 = tpu.matmul %37, %36, %cst_42 {dimension_numbers = #tpu.dot_dimension_numbers<[1], [0], [0], [1], [0, 0, 1, 1], [], []>} : vector<2x16xf32>, vector<16x16xf32>, vector<2x16xf32> -> vector<2x16xf32>
    %50 = arith.addf %48, %49 : vector<2x16xf32>
    %51 = arith.negf %41 : vector<2x16xf32>
    %52 = math.exp %51 : vector<2x16xf32>
    %cst_43 = arith.constant 1.000000e+00 : f32
    %53 = vector.broadcast %cst_43 : f32 to vector<2x16xf32>
    %54 = arith.addf %53, %52 : vector<2x16xf32>
    %55 = arith.divf %53, %54 : vector<2x16xf32>
    %56 = arith.negf %44 : vector<2x16xf32>
    %57 = math.exp %56 : vector<2x16xf32>
    %cst_44 = arith.constant 1.000000e+00 : f32
    %58 = vector.broadcast %cst_44 : f32 to vector<2x16xf32>
    %59 = arith.addf %58, %57 : vector<2x16xf32>
    %60 = arith.divf %58, %59 : vector<2x16xf32>
    %61 = math.tanh %47 : vector<2x16xf32>
    %62 = arith.negf %50 : vector<2x16xf32>
    %63 = math.exp %62 : vector<2x16xf32>
    %cst_45 = arith.constant 1.000000e+00 : f32
    %64 = vector.broadcast %cst_45 : f32 to vector<2x16xf32>
    %65 = arith.addf %64, %63 : vector<2x16xf32>
    %66 = arith.divf %64, %65 : vector<2x16xf32>
    %67 = arith.mulf %60, %38 : vector<2x16xf32>
    %68 = arith.mulf %55, %61 : vector<2x16xf32>
    %69 = arith.addf %67, %68 : vector<2x16xf32>
    %70 = math.tanh %69 : vector<2x16xf32>
    %71 = arith.mulf %66, %70 : vector<2x16xf32>
    %72 = vector.extract_strided_slice %7 {offsets = [2, 0], sizes = [2, 16], strides = [1, 1]} : vector<16x16xf32> to vector<2x16xf32>
    %cst_46 = arith.constant dense<0.000000e+00> : vector<2x16xf32>
    %73 = tpu.matmul %71, %30, %cst_46 {dimension_numbers = #tpu.dot_dimension_numbers<[1], [0], [0], [1], [0, 0, 1, 1], [], []>} : vector<2x16xf32>, vector<16x16xf32>, vector<2x16xf32> -> vector<2x16xf32>
    %74 = arith.addf %72, %73 : vector<2x16xf32>
    %75 = vector.extract_strided_slice %14 {offsets = [2, 0], sizes = [2, 16], strides = [1, 1]} : vector<16x16xf32> to vector<2x16xf32>
    %cst_47 = arith.constant dense<0.000000e+00> : vector<2x16xf32>
    %76 = tpu.matmul %71, %32, %cst_47 {dimension_numbers = #tpu.dot_dimension_numbers<[1], [0], [0], [1], [0, 0, 1, 1], [], []>} : vector<2x16xf32>, vector<16x16xf32>, vector<2x16xf32> -> vector<2x16xf32>
    %77 = arith.addf %75, %76 : vector<2x16xf32>
    %78 = vector.extract_strided_slice %21 {offsets = [2, 0], sizes = [2, 16], strides = [1, 1]} : vector<16x16xf32> to vector<2x16xf32>
    %cst_48 = arith.constant dense<0.000000e+00> : vector<2x16xf32>
    %79 = tpu.matmul %71, %34, %cst_48 {dimension_numbers = #tpu.dot_dimension_numbers<[1], [0], [0], [1], [0, 0, 1, 1], [], []>} : vector<2x16xf32>, vector<16x16xf32>, vector<2x16xf32> -> vector<2x16xf32>
    %80 = arith.addf %78, %79 : vector<2x16xf32>
    %81 = vector.extract_strided_slice %28 {offsets = [2, 0], sizes = [2, 16], strides = [1, 1]} : vector<16x16xf32> to vector<2x16xf32>
    %cst_49 = arith.constant dense<0.000000e+00> : vector<2x16xf32>
    %82 = tpu.matmul %71, %36, %cst_49 {dimension_numbers = #tpu.dot_dimension_numbers<[1], [0], [0], [1], [0, 0, 1, 1], [], []>} : vector<2x16xf32>, vector<16x16xf32>, vector<2x16xf32> -> vector<2x16xf32>
    %83 = arith.addf %81, %82 : vector<2x16xf32>
    %84 = arith.negf %74 : vector<2x16xf32>
    %85 = math.exp %84 : vector<2x16xf32>
    %cst_50 = arith.constant 1.000000e+00 : f32
    %86 = vector.broadcast %cst_50 : f32 to vector<2x16xf32>
    %87 = arith.addf %86, %85 : vector<2x16xf32>
    %88 = arith.divf %86, %87 : vector<2x16xf32>
    %89 = arith.negf %77 : vector<2x16xf32>
    %90 = math.exp %89 : vector<2x16xf32>
    %cst_51 = arith.constant 1.000000e+00 : f32
    %91 = vector.broadcast %cst_51 : f32 to vector<2x16xf32>
    %92 = arith.addf %91, %90 : vector<2x16xf32>
    %93 = arith.divf %91, %92 : vector<2x16xf32>
    %94 = math.tanh %80 : vector<2x16xf32>
    %95 = arith.negf %83 : vector<2x16xf32>
    %96 = math.exp %95 : vector<2x16xf32>
    %cst_52 = arith.constant 1.000000e+00 : f32
    %97 = vector.broadcast %cst_52 : f32 to vector<2x16xf32>
    %98 = arith.addf %97, %96 : vector<2x16xf32>
    %99 = arith.divf %97, %98 : vector<2x16xf32>
    %100 = arith.mulf %93, %69 : vector<2x16xf32>
    %101 = arith.mulf %88, %94 : vector<2x16xf32>
    %102 = arith.addf %100, %101 : vector<2x16xf32>
    %103 = math.tanh %102 : vector<2x16xf32>
    %104 = arith.mulf %99, %103 : vector<2x16xf32>
    %105 = vector.extract_strided_slice %7 {offsets = [4, 0], sizes = [2, 16], strides = [1, 1]} : vector<16x16xf32> to vector<2x16xf32>
    %cst_53 = arith.constant dense<0.000000e+00> : vector<2x16xf32>
    %106 = tpu.matmul %104, %30, %cst_53 {dimension_numbers = #tpu.dot_dimension_numbers<[1], [0], [0], [1], [0, 0, 1, 1], [], []>} : vector<2x16xf32>, vector<16x16xf32>, vector<2x16xf32> -> vector<2x16xf32>
    %107 = arith.addf %105, %106 : vector<2x16xf32>
    %108 = vector.extract_strided_slice %14 {offsets = [4, 0], sizes = [2, 16], strides = [1, 1]} : vector<16x16xf32> to vector<2x16xf32>
    %cst_54 = arith.constant dense<0.000000e+00> : vector<2x16xf32>
    %109 = tpu.matmul %104, %32, %cst_54 {dimension_numbers = #tpu.dot_dimension_numbers<[1], [0], [0], [1], [0, 0, 1, 1], [], []>} : vector<2x16xf32>, vector<16x16xf32>, vector<2x16xf32> -> vector<2x16xf32>
    %110 = arith.addf %108, %109 : vector<2x16xf32>
    %111 = vector.extract_strided_slice %21 {offsets = [4, 0], sizes = [2, 16], strides = [1, 1]} : vector<16x16xf32> to vector<2x16xf32>
    %cst_55 = arith.constant dense<0.000000e+00> : vector<2x16xf32>
    %112 = tpu.matmul %104, %34, %cst_55 {dimension_numbers = #tpu.dot_dimension_numbers<[1], [0], [0], [1], [0, 0, 1, 1], [], []>} : vector<2x16xf32>, vector<16x16xf32>, vector<2x16xf32> -> vector<2x16xf32>
    %113 = arith.addf %111, %112 : vector<2x16xf32>
    %114 = vector.extract_strided_slice %28 {offsets = [4, 0], sizes = [2, 16], strides = [1, 1]} : vector<16x16xf32> to vector<2x16xf32>
    %cst_56 = arith.constant dense<0.000000e+00> : vector<2x16xf32>
    %115 = tpu.matmul %104, %36, %cst_56 {dimension_numbers = #tpu.dot_dimension_numbers<[1], [0], [0], [1], [0, 0, 1, 1], [], []>} : vector<2x16xf32>, vector<16x16xf32>, vector<2x16xf32> -> vector<2x16xf32>
    %116 = arith.addf %114, %115 : vector<2x16xf32>
    %117 = arith.negf %107 : vector<2x16xf32>
    %118 = math.exp %117 : vector<2x16xf32>
    %cst_57 = arith.constant 1.000000e+00 : f32
    %119 = vector.broadcast %cst_57 : f32 to vector<2x16xf32>
    %120 = arith.addf %119, %118 : vector<2x16xf32>
    %121 = arith.divf %119, %120 : vector<2x16xf32>
    %122 = arith.negf %110 : vector<2x16xf32>
    %123 = math.exp %122 : vector<2x16xf32>
    %cst_58 = arith.constant 1.000000e+00 : f32
    %124 = vector.broadcast %cst_58 : f32 to vector<2x16xf32>
    %125 = arith.addf %124, %123 : vector<2x16xf32>
    %126 = arith.divf %124, %125 : vector<2x16xf32>
    %127 = math.tanh %113 : vector<2x16xf32>
    %128 = arith.negf %116 : vector<2x16xf32>
    %129 = math.exp %128 : vector<2x16xf32>
    %cst_59 = arith.constant 1.000000e+00 : f32
    %130 = vector.broadcast %cst_59 : f32 to vector<2x16xf32>
    %131 = arith.addf %130, %129 : vector<2x16xf32>
    %132 = arith.divf %130, %131 : vector<2x16xf32>
    %133 = arith.mulf %126, %102 : vector<2x16xf32>
    %134 = arith.mulf %121, %127 : vector<2x16xf32>
    %135 = arith.addf %133, %134 : vector<2x16xf32>
    %136 = math.tanh %135 : vector<2x16xf32>
    %137 = arith.mulf %132, %136 : vector<2x16xf32>
    %138 = vector.extract_strided_slice %7 {offsets = [6, 0], sizes = [2, 16], strides = [1, 1]} : vector<16x16xf32> to vector<2x16xf32>
    %cst_60 = arith.constant dense<0.000000e+00> : vector<2x16xf32>
    %139 = tpu.matmul %137, %30, %cst_60 {dimension_numbers = #tpu.dot_dimension_numbers<[1], [0], [0], [1], [0, 0, 1, 1], [], []>} : vector<2x16xf32>, vector<16x16xf32>, vector<2x16xf32> -> vector<2x16xf32>
    %140 = arith.addf %138, %139 : vector<2x16xf32>
    %141 = vector.extract_strided_slice %14 {offsets = [6, 0], sizes = [2, 16], strides = [1, 1]} : vector<16x16xf32> to vector<2x16xf32>
    %cst_61 = arith.constant dense<0.000000e+00> : vector<2x16xf32>
    %142 = tpu.matmul %137, %32, %cst_61 {dimension_numbers = #tpu.dot_dimension_numbers<[1], [0], [0], [1], [0, 0, 1, 1], [], []>} : vector<2x16xf32>, vector<16x16xf32>, vector<2x16xf32> -> vector<2x16xf32>
    %143 = arith.addf %141, %142 : vector<2x16xf32>
    %144 = vector.extract_strided_slice %21 {offsets = [6, 0], sizes = [2, 16], strides = [1, 1]} : vector<16x16xf32> to vector<2x16xf32>
    %cst_62 = arith.constant dense<0.000000e+00> : vector<2x16xf32>
    %145 = tpu.matmul %137, %34, %cst_62 {dimension_numbers = #tpu.dot_dimension_numbers<[1], [0], [0], [1], [0, 0, 1, 1], [], []>} : vector<2x16xf32>, vector<16x16xf32>, vector<2x16xf32> -> vector<2x16xf32>
    %146 = arith.addf %144, %145 : vector<2x16xf32>
    %147 = vector.extract_strided_slice %28 {offsets = [6, 0], sizes = [2, 16], strides = [1, 1]} : vector<16x16xf32> to vector<2x16xf32>
    %cst_63 = arith.constant dense<0.000000e+00> : vector<2x16xf32>
    %148 = tpu.matmul %137, %36, %cst_63 {dimension_numbers = #tpu.dot_dimension_numbers<[1], [0], [0], [1], [0, 0, 1, 1], [], []>} : vector<2x16xf32>, vector<16x16xf32>, vector<2x16xf32> -> vector<2x16xf32>
    %149 = arith.addf %147, %148 : vector<2x16xf32>
    %150 = arith.negf %140 : vector<2x16xf32>
    %151 = math.exp %150 : vector<2x16xf32>
    %cst_64 = arith.constant 1.000000e+00 : f32
    %152 = vector.broadcast %cst_64 : f32 to vector<2x16xf32>
    %153 = arith.addf %152, %151 : vector<2x16xf32>
    %154 = arith.divf %152, %153 : vector<2x16xf32>
    %155 = arith.negf %143 : vector<2x16xf32>
    %156 = math.exp %155 : vector<2x16xf32>
    %cst_65 = arith.constant 1.000000e+00 : f32
    %157 = vector.broadcast %cst_65 : f32 to vector<2x16xf32>
    %158 = arith.addf %157, %156 : vector<2x16xf32>
    %159 = arith.divf %157, %158 : vector<2x16xf32>
    %160 = math.tanh %146 : vector<2x16xf32>
    %161 = arith.negf %149 : vector<2x16xf32>
    %162 = math.exp %161 : vector<2x16xf32>
    %cst_66 = arith.constant 1.000000e+00 : f32
    %163 = vector.broadcast %cst_66 : f32 to vector<2x16xf32>
    %164 = arith.addf %163, %162 : vector<2x16xf32>
    %165 = arith.divf %163, %164 : vector<2x16xf32>
    %166 = arith.mulf %159, %135 : vector<2x16xf32>
    %167 = arith.mulf %154, %160 : vector<2x16xf32>
    %168 = arith.addf %166, %167 : vector<2x16xf32>
    %169 = math.tanh %168 : vector<2x16xf32>
    %170 = arith.mulf %165, %169 : vector<2x16xf32>
    %171 = vector.extract_strided_slice %7 {offsets = [8, 0], sizes = [2, 16], strides = [1, 1]} : vector<16x16xf32> to vector<2x16xf32>
    %cst_67 = arith.constant dense<0.000000e+00> : vector<2x16xf32>
    %172 = tpu.matmul %170, %30, %cst_67 {dimension_numbers = #tpu.dot_dimension_numbers<[1], [0], [0], [1], [0, 0, 1, 1], [], []>} : vector<2x16xf32>, vector<16x16xf32>, vector<2x16xf32> -> vector<2x16xf32>
    %173 = arith.addf %171, %172 : vector<2x16xf32>
    %174 = vector.extract_strided_slice %14 {offsets = [8, 0], sizes = [2, 16], strides = [1, 1]} : vector<16x16xf32> to vector<2x16xf32>
    %cst_68 = arith.constant dense<0.000000e+00> : vector<2x16xf32>
    %175 = tpu.matmul %170, %32, %cst_68 {dimension_numbers = #tpu.dot_dimension_numbers<[1], [0], [0], [1], [0, 0, 1, 1], [], []>} : vector<2x16xf32>, vector<16x16xf32>, vector<2x16xf32> -> vector<2x16xf32>
    %176 = arith.addf %174, %175 : vector<2x16xf32>
    %177 = vector.extract_strided_slice %21 {offsets = [8, 0], sizes = [2, 16], strides = [1, 1]} : vector<16x16xf32> to vector<2x16xf32>
    %cst_69 = arith.constant dense<0.000000e+00> : vector<2x16xf32>
    %178 = tpu.matmul %170, %34, %cst_69 {dimension_numbers = #tpu.dot_dimension_numbers<[1], [0], [0], [1], [0, 0, 1, 1], [], []>} : vector<2x16xf32>, vector<16x16xf32>, vector<2x16xf32> -> vector<2x16xf32>
    %179 = arith.addf %177, %178 : vector<2x16xf32>
    %180 = vector.extract_strided_slice %28 {offsets = [8, 0], sizes = [2, 16], strides = [1, 1]} : vector<16x16xf32> to vector<2x16xf32>
    %cst_70 = arith.constant dense<0.000000e+00> : vector<2x16xf32>
    %181 = tpu.matmul %170, %36, %cst_70 {dimension_numbers = #tpu.dot_dimension_numbers<[1], [0], [0], [1], [0, 0, 1, 1], [], []>} : vector<2x16xf32>, vector<16x16xf32>, vector<2x16xf32> -> vector<2x16xf32>
    %182 = arith.addf %180, %181 : vector<2x16xf32>
    %183 = arith.negf %173 : vector<2x16xf32>
    %184 = math.exp %183 : vector<2x16xf32>
    %cst_71 = arith.constant 1.000000e+00 : f32
    %185 = vector.broadcast %cst_71 : f32 to vector<2x16xf32>
    %186 = arith.addf %185, %184 : vector<2x16xf32>
    %187 = arith.divf %185, %186 : vector<2x16xf32>
    %188 = arith.negf %176 : vector<2x16xf32>
    %189 = math.exp %188 : vector<2x16xf32>
    %cst_72 = arith.constant 1.000000e+00 : f32
    %190 = vector.broadcast %cst_72 : f32 to vector<2x16xf32>
    %191 = arith.addf %190, %189 : vector<2x16xf32>
    %192 = arith.divf %190, %191 : vector<2x16xf32>
    %193 = math.tanh %179 : vector<2x16xf32>
    %194 = arith.negf %182 : vector<2x16xf32>
    %195 = math.exp %194 : vector<2x16xf32>
    %cst_73 = arith.constant 1.000000e+00 : f32
    %196 = vector.broadcast %cst_73 : f32 to vector<2x16xf32>
    %197 = arith.addf %196, %195 : vector<2x16xf32>
    %198 = arith.divf %196, %197 : vector<2x16xf32>
    %199 = arith.mulf %192, %168 : vector<2x16xf32>
    %200 = arith.mulf %187, %193 : vector<2x16xf32>
    %201 = arith.addf %199, %200 : vector<2x16xf32>
    %202 = math.tanh %201 : vector<2x16xf32>
    %203 = arith.mulf %198, %202 : vector<2x16xf32>
    %204 = vector.extract_strided_slice %7 {offsets = [10, 0], sizes = [2, 16], strides = [1, 1]} : vector<16x16xf32> to vector<2x16xf32>
    %cst_74 = arith.constant dense<0.000000e+00> : vector<2x16xf32>
    %205 = tpu.matmul %203, %30, %cst_74 {dimension_numbers = #tpu.dot_dimension_numbers<[1], [0], [0], [1], [0, 0, 1, 1], [], []>} : vector<2x16xf32>, vector<16x16xf32>, vector<2x16xf32> -> vector<2x16xf32>
    %206 = arith.addf %204, %205 : vector<2x16xf32>
    %207 = vector.extract_strided_slice %14 {offsets = [10, 0], sizes = [2, 16], strides = [1, 1]} : vector<16x16xf32> to vector<2x16xf32>
    %cst_75 = arith.constant dense<0.000000e+00> : vector<2x16xf32>
    %208 = tpu.matmul %203, %32, %cst_75 {dimension_numbers = #tpu.dot_dimension_numbers<[1], [0], [0], [1], [0, 0, 1, 1], [], []>} : vector<2x16xf32>, vector<16x16xf32>, vector<2x16xf32> -> vector<2x16xf32>
    %209 = arith.addf %207, %208 : vector<2x16xf32>
    %210 = vector.extract_strided_slice %21 {offsets = [10, 0], sizes = [2, 16], strides = [1, 1]} : vector<16x16xf32> to vector<2x16xf32>
    %cst_76 = arith.constant dense<0.000000e+00> : vector<2x16xf32>
    %211 = tpu.matmul %203, %34, %cst_76 {dimension_numbers = #tpu.dot_dimension_numbers<[1], [0], [0], [1], [0, 0, 1, 1], [], []>} : vector<2x16xf32>, vector<16x16xf32>, vector<2x16xf32> -> vector<2x16xf32>
    %212 = arith.addf %210, %211 : vector<2x16xf32>
    %213 = vector.extract_strided_slice %28 {offsets = [10, 0], sizes = [2, 16], strides = [1, 1]} : vector<16x16xf32> to vector<2x16xf32>
    %cst_77 = arith.constant dense<0.000000e+00> : vector<2x16xf32>
    %214 = tpu.matmul %203, %36, %cst_77 {dimension_numbers = #tpu.dot_dimension_numbers<[1], [0], [0], [1], [0, 0, 1, 1], [], []>} : vector<2x16xf32>, vector<16x16xf32>, vector<2x16xf32> -> vector<2x16xf32>
    %215 = arith.addf %213, %214 : vector<2x16xf32>
    %216 = arith.negf %206 : vector<2x16xf32>
    %217 = math.exp %216 : vector<2x16xf32>
    %cst_78 = arith.constant 1.000000e+00 : f32
    %218 = vector.broadcast %cst_78 : f32 to vector<2x16xf32>
    %219 = arith.addf %218, %217 : vector<2x16xf32>
    %220 = arith.divf %218, %219 : vector<2x16xf32>
    %221 = arith.negf %209 : vector<2x16xf32>
    %222 = math.exp %221 : vector<2x16xf32>
    %cst_79 = arith.constant 1.000000e+00 : f32
    %223 = vector.broadcast %cst_79 : f32 to vector<2x16xf32>
    %224 = arith.addf %223, %222 : vector<2x16xf32>
    %225 = arith.divf %223, %224 : vector<2x16xf32>
    %226 = math.tanh %212 : vector<2x16xf32>
    %227 = arith.negf %215 : vector<2x16xf32>
    %228 = math.exp %227 : vector<2x16xf32>
    %cst_80 = arith.constant 1.000000e+00 : f32
    %229 = vector.broadcast %cst_80 : f32 to vector<2x16xf32>
    %230 = arith.addf %229, %228 : vector<2x16xf32>
    %231 = arith.divf %229, %230 : vector<2x16xf32>
    %232 = arith.mulf %225, %201 : vector<2x16xf32>
    %233 = arith.mulf %220, %226 : vector<2x16xf32>
    %234 = arith.addf %232, %233 : vector<2x16xf32>
    %235 = math.tanh %234 : vector<2x16xf32>
    %236 = arith.mulf %231, %235 : vector<2x16xf32>
    %237 = vector.extract_strided_slice %7 {offsets = [12, 0], sizes = [2, 16], strides = [1, 1]} : vector<16x16xf32> to vector<2x16xf32>
    %cst_81 = arith.constant dense<0.000000e+00> : vector<2x16xf32>
    %238 = tpu.matmul %236, %30, %cst_81 {dimension_numbers = #tpu.dot_dimension_numbers<[1], [0], [0], [1], [0, 0, 1, 1], [], []>} : vector<2x16xf32>, vector<16x16xf32>, vector<2x16xf32> -> vector<2x16xf32>
    %239 = arith.addf %237, %238 : vector<2x16xf32>
    %240 = vector.extract_strided_slice %14 {offsets = [12, 0], sizes = [2, 16], strides = [1, 1]} : vector<16x16xf32> to vector<2x16xf32>
    %cst_82 = arith.constant dense<0.000000e+00> : vector<2x16xf32>
    %241 = tpu.matmul %236, %32, %cst_82 {dimension_numbers = #tpu.dot_dimension_numbers<[1], [0], [0], [1], [0, 0, 1, 1], [], []>} : vector<2x16xf32>, vector<16x16xf32>, vector<2x16xf32> -> vector<2x16xf32>
    %242 = arith.addf %240, %241 : vector<2x16xf32>
    %243 = vector.extract_strided_slice %21 {offsets = [12, 0], sizes = [2, 16], strides = [1, 1]} : vector<16x16xf32> to vector<2x16xf32>
    %cst_83 = arith.constant dense<0.000000e+00> : vector<2x16xf32>
    %244 = tpu.matmul %236, %34, %cst_83 {dimension_numbers = #tpu.dot_dimension_numbers<[1], [0], [0], [1], [0, 0, 1, 1], [], []>} : vector<2x16xf32>, vector<16x16xf32>, vector<2x16xf32> -> vector<2x16xf32>
    %245 = arith.addf %243, %244 : vector<2x16xf32>
    %246 = vector.extract_strided_slice %28 {offsets = [12, 0], sizes = [2, 16], strides = [1, 1]} : vector<16x16xf32> to vector<2x16xf32>
    %cst_84 = arith.constant dense<0.000000e+00> : vector<2x16xf32>
    %247 = tpu.matmul %236, %36, %cst_84 {dimension_numbers = #tpu.dot_dimension_numbers<[1], [0], [0], [1], [0, 0, 1, 1], [], []>} : vector<2x16xf32>, vector<16x16xf32>, vector<2x16xf32> -> vector<2x16xf32>
    %248 = arith.addf %246, %247 : vector<2x16xf32>
    %249 = arith.negf %239 : vector<2x16xf32>
    %250 = math.exp %249 : vector<2x16xf32>
    %cst_85 = arith.constant 1.000000e+00 : f32
    %251 = vector.broadcast %cst_85 : f32 to vector<2x16xf32>
    %252 = arith.addf %251, %250 : vector<2x16xf32>
    %253 = arith.divf %251, %252 : vector<2x16xf32>
    %254 = arith.negf %242 : vector<2x16xf32>
    %255 = math.exp %254 : vector<2x16xf32>
    %cst_86 = arith.constant 1.000000e+00 : f32
    %256 = vector.broadcast %cst_86 : f32 to vector<2x16xf32>
    %257 = arith.addf %256, %255 : vector<2x16xf32>
    %258 = arith.divf %256, %257 : vector<2x16xf32>
    %259 = math.tanh %245 : vector<2x16xf32>
    %260 = arith.negf %248 : vector<2x16xf32>
    %261 = math.exp %260 : vector<2x16xf32>
    %cst_87 = arith.constant 1.000000e+00 : f32
    %262 = vector.broadcast %cst_87 : f32 to vector<2x16xf32>
    %263 = arith.addf %262, %261 : vector<2x16xf32>
    %264 = arith.divf %262, %263 : vector<2x16xf32>
    %265 = arith.mulf %258, %234 : vector<2x16xf32>
    %266 = arith.mulf %253, %259 : vector<2x16xf32>
    %267 = arith.addf %265, %266 : vector<2x16xf32>
    %268 = math.tanh %267 : vector<2x16xf32>
    %269 = arith.mulf %264, %268 : vector<2x16xf32>
    %270 = vector.extract_strided_slice %7 {offsets = [14, 0], sizes = [2, 16], strides = [1, 1]} : vector<16x16xf32> to vector<2x16xf32>
    %cst_88 = arith.constant dense<0.000000e+00> : vector<2x16xf32>
    %271 = tpu.matmul %269, %30, %cst_88 {dimension_numbers = #tpu.dot_dimension_numbers<[1], [0], [0], [1], [0, 0, 1, 1], [], []>} : vector<2x16xf32>, vector<16x16xf32>, vector<2x16xf32> -> vector<2x16xf32>
    %272 = arith.addf %270, %271 : vector<2x16xf32>
    %273 = vector.extract_strided_slice %14 {offsets = [14, 0], sizes = [2, 16], strides = [1, 1]} : vector<16x16xf32> to vector<2x16xf32>
    %cst_89 = arith.constant dense<0.000000e+00> : vector<2x16xf32>
    %274 = tpu.matmul %269, %32, %cst_89 {dimension_numbers = #tpu.dot_dimension_numbers<[1], [0], [0], [1], [0, 0, 1, 1], [], []>} : vector<2x16xf32>, vector<16x16xf32>, vector<2x16xf32> -> vector<2x16xf32>
    %275 = arith.addf %273, %274 : vector<2x16xf32>
    %276 = vector.extract_strided_slice %21 {offsets = [14, 0], sizes = [2, 16], strides = [1, 1]} : vector<16x16xf32> to vector<2x16xf32>
    %cst_90 = arith.constant dense<0.000000e+00> : vector<2x16xf32>
    %277 = tpu.matmul %269, %34, %cst_90 {dimension_numbers = #tpu.dot_dimension_numbers<[1], [0], [0], [1], [0, 0, 1, 1], [], []>} : vector<2x16xf32>, vector<16x16xf32>, vector<2x16xf32> -> vector<2x16xf32>
    %278 = arith.addf %276, %277 : vector<2x16xf32>
    %279 = vector.extract_strided_slice %28 {offsets = [14, 0], sizes = [2, 16], strides = [1, 1]} : vector<16x16xf32> to vector<2x16xf32>
    %cst_91 = arith.constant dense<0.000000e+00> : vector<2x16xf32>
    %280 = tpu.matmul %269, %36, %cst_91 {dimension_numbers = #tpu.dot_dimension_numbers<[1], [0], [0], [1], [0, 0, 1, 1], [], []>} : vector<2x16xf32>, vector<16x16xf32>, vector<2x16xf32> -> vector<2x16xf32>
    %281 = arith.addf %279, %280 : vector<2x16xf32>
    %282 = arith.negf %272 : vector<2x16xf32>
    %283 = math.exp %282 : vector<2x16xf32>
    %cst_92 = arith.constant 1.000000e+00 : f32
    %284 = vector.broadcast %cst_92 : f32 to vector<2x16xf32>
    %285 = arith.addf %284, %283 : vector<2x16xf32>
    %286 = arith.divf %284, %285 : vector<2x16xf32>
    %287 = arith.negf %275 : vector<2x16xf32>
    %288 = math.exp %287 : vector<2x16xf32>
    %cst_93 = arith.constant 1.000000e+00 : f32
    %289 = vector.broadcast %cst_93 : f32 to vector<2x16xf32>
    %290 = arith.addf %289, %288 : vector<2x16xf32>
    %291 = arith.divf %289, %290 : vector<2x16xf32>
    %292 = math.tanh %278 : vector<2x16xf32>
    %293 = arith.negf %281 : vector<2x16xf32>
    %294 = math.exp %293 : vector<2x16xf32>
    %cst_94 = arith.constant 1.000000e+00 : f32
    %295 = vector.broadcast %cst_94 : f32 to vector<2x16xf32>
    %296 = arith.addf %295, %294 : vector<2x16xf32>
    %297 = arith.divf %295, %296 : vector<2x16xf32>
    %298 = arith.mulf %291, %267 : vector<2x16xf32>
    %299 = arith.mulf %286, %292 : vector<2x16xf32>
    %300 = arith.addf %298, %299 : vector<2x16xf32>
    %301 = math.tanh %300 : vector<2x16xf32>
    %302 = arith.mulf %297, %301 : vector<2x16xf32>
    %303 = vector.extract_strided_slice %0 {offsets = [14, 0], sizes = [2, 16], strides = [1, 1]} : vector<16x16xf32> to vector<2x16xf32>
    %c0_95 = arith.constant 0 : index
    %c0_96 = arith.constant 0 : index
    %c0_97 = arith.constant 0 : index
    %304 = vector.load %arg4[%c0_95, %c0_96, %c0_97] : memref<3x16x16xf32, #tpu.memory_space<vmem>>, vector<1x16x16xf32>
    %305 = vector.shape_cast %304 : vector<1x16x16xf32> to vector<16x16xf32>
    %cst_98 = arith.constant dense<0.000000e+00> : vector<2x16xf32>
    %306 = tpu.matmul %303, %305, %cst_98 {dimension_numbers = #tpu.dot_dimension_numbers<[1], [0], [0], [1], [0, 0, 1, 1], [], []>} : vector<2x16xf32>, vector<16x16xf32>, vector<2x16xf32> -> vector<2x16xf32>
    %c0_99 = arith.constant 0 : index
    %c0_100 = arith.constant 0 : index
    %c0_101 = arith.constant 0 : index
    %307 = vector.load %arg5[%c0_99, %c0_100, %c0_101] : memref<3x1x16xf32, #tpu.memory_space<vmem>>, vector<1x1x16xf32>
    %308 = vector.shape_cast %307 : vector<1x1x16xf32> to vector<1x16xf32>
    %309 = vector.broadcast %308 : vector<1x16xf32> to vector<2x16xf32>
    %310 = arith.addf %306, %309 : vector<2x16xf32>
    %c1_102 = arith.constant 1 : index
    %c0_103 = arith.constant 0 : index
    %c0_104 = arith.constant 0 : index
    %311 = vector.load %arg4[%c1_102, %c0_103, %c0_104] : memref<3x16x16xf32, #tpu.memory_space<vmem>>, vector<1x16x16xf32>
    %312 = vector.shape_cast %311 : vector<1x16x16xf32> to vector<16x16xf32>
    %cst_105 = arith.constant dense<0.000000e+00> : vector<2x16xf32>
    %313 = tpu.matmul %303, %312, %cst_105 {dimension_numbers = #tpu.dot_dimension_numbers<[1], [0], [0], [1], [0, 0, 1, 1], [], []>} : vector<2x16xf32>, vector<16x16xf32>, vector<2x16xf32> -> vector<2x16xf32>
    %c1_106 = arith.constant 1 : index
    %c0_107 = arith.constant 0 : index
    %c0_108 = arith.constant 0 : index
    %314 = vector.load %arg5[%c1_106, %c0_107, %c0_108] : memref<3x1x16xf32, #tpu.memory_space<vmem>>, vector<1x1x16xf32>
    %315 = vector.shape_cast %314 : vector<1x1x16xf32> to vector<1x16xf32>
    %316 = vector.broadcast %315 : vector<1x16xf32> to vector<2x16xf32>
    %317 = arith.addf %313, %316 : vector<2x16xf32>
    %c2_109 = arith.constant 2 : index
    %c0_110 = arith.constant 0 : index
    %c0_111 = arith.constant 0 : index
    %318 = vector.load %arg4[%c2_109, %c0_110, %c0_111] : memref<3x16x16xf32, #tpu.memory_space<vmem>>, vector<1x16x16xf32>
    %319 = vector.shape_cast %318 : vector<1x16x16xf32> to vector<16x16xf32>
    %cst_112 = arith.constant dense<0.000000e+00> : vector<2x16xf32>
    %320 = tpu.matmul %303, %319, %cst_112 {dimension_numbers = #tpu.dot_dimension_numbers<[1], [0], [0], [1], [0, 0, 1, 1], [], []>} : vector<2x16xf32>, vector<16x16xf32>, vector<2x16xf32> -> vector<2x16xf32>
    %c2_113 = arith.constant 2 : index
    %c0_114 = arith.constant 0 : index
    %c0_115 = arith.constant 0 : index
    %321 = vector.load %arg5[%c2_113, %c0_114, %c0_115] : memref<3x1x16xf32, #tpu.memory_space<vmem>>, vector<1x1x16xf32>
    %322 = vector.shape_cast %321 : vector<1x1x16xf32> to vector<1x16xf32>
    %323 = vector.broadcast %322 : vector<1x16xf32> to vector<2x16xf32>
    %324 = arith.addf %320, %323 : vector<2x16xf32>
    %325 = arith.negf %310 : vector<2x16xf32>
    %326 = math.exp %325 : vector<2x16xf32>
    %cst_116 = arith.constant 1.000000e+00 : f32
    %327 = vector.broadcast %cst_116 : f32 to vector<2x16xf32>
    %328 = arith.addf %327, %326 : vector<2x16xf32>
    %329 = arith.divf %327, %328 : vector<2x16xf32>
    %330 = math.tanh %317 : vector<2x16xf32>
    %331 = arith.mulf %329, %330 : vector<2x16xf32>
    %332 = arith.negf %324 : vector<2x16xf32>
    %333 = math.exp %332 : vector<2x16xf32>
    %cst_117 = arith.constant 1.000000e+00 : f32
    %334 = vector.broadcast %cst_117 : f32 to vector<2x16xf32>
    %335 = arith.addf %334, %333 : vector<2x16xf32>
    %336 = arith.divf %334, %335 : vector<2x16xf32>
    %337 = math.tanh %331 : vector<2x16xf32>
    %338 = arith.mulf %336, %337 : vector<2x16xf32>
    %c0_118 = arith.constant 0 : index
    %c0_119 = arith.constant 0 : index
    %339 = vector.load %arg6[%c0_118, %c0_119] : memref<16x32xf32, #tpu.memory_space<vmem>>, vector<16x32xf32>
    %cst_120 = arith.constant dense<0.000000e+00> : vector<2x32xf32>
    %340 = tpu.matmul %302, %339, %cst_120 {dimension_numbers = #tpu.dot_dimension_numbers<[1], [0], [0], [1], [0, 0, 1, 1], [], []>} : vector<2x16xf32>, vector<16x32xf32>, vector<2x32xf32> -> vector<2x32xf32>
    %c0_121 = arith.constant 0 : index
    %c0_122 = arith.constant 0 : index
    %341 = vector.load %arg7[%c0_121, %c0_122] : memref<16x32xf32, #tpu.memory_space<vmem>>, vector<16x32xf32>
    %cst_123 = arith.constant dense<0.000000e+00> : vector<2x32xf32>
    %342 = tpu.matmul %338, %341, %cst_123 {dimension_numbers = #tpu.dot_dimension_numbers<[1], [0], [0], [1], [0, 0, 1, 1], [], []>} : vector<2x16xf32>, vector<16x32xf32>, vector<2x32xf32> -> vector<2x32xf32>
    %343 = arith.addf %340, %342 : vector<2x32xf32>
    %c0_124 = arith.constant 0 : index
    %c0_125 = arith.constant 0 : index
    %344 = vector.load %arg8[%c0_124, %c0_125] : memref<1x32xf32, #tpu.memory_space<vmem>>, vector<1x32xf32>
    %345 = vector.broadcast %344 : vector<1x32xf32> to vector<2x32xf32>
    %346 = arith.addf %343, %345 : vector<2x32xf32>
    %cst_126 = arith.constant 0.000000e+00 : f32
    %347 = vector.broadcast %cst_126 : f32 to vector<2x32xf32>
    %348 = arith.cmpf ogt, %346, %347 : vector<2x32xf32>
    %cst_127 = arith.constant 0.00999999977 : f32
    %349 = vector.broadcast %cst_127 : f32 to vector<2x32xf32>
    %350 = arith.mulf %349, %346 : vector<2x32xf32>
    %351 = arith.select %348, %346, %350 : vector<2x32xi1>, vector<2x32xf32>
    %c0_128 = arith.constant 0 : index
    %c0_129 = arith.constant 0 : index
    %352 = vector.load %arg9[%c0_128, %c0_129] : memref<32x3xf32, #tpu.memory_space<vmem>>, vector<32x3xf32>
    %cst_130 = arith.constant dense<0.000000e+00> : vector<2x3xf32>
    %353 = tpu.matmul %351, %352, %cst_130 {dimension_numbers = #tpu.dot_dimension_numbers<[1], [0], [0], [1], [0, 0, 1, 1], [], []>} : vector<2x32xf32>, vector<32x3xf32>, vector<2x3xf32> -> vector<2x3xf32>
    %c0_131 = arith.constant 0 : index
    %c0_132 = arith.constant 0 : index
    %354 = vector.load %arg10[%c0_131, %c0_132] : memref<1x3xf32, #tpu.memory_space<vmem>>, vector<1x3xf32>
    %355 = vector.broadcast %354 : vector<1x3xf32> to vector<2x3xf32>
    %356 = arith.addf %353, %355 : vector<2x3xf32>
    %c0_133 = arith.constant 0 : index
    %c0_134 = arith.constant 0 : index
    %357 = vector.load %arg11[%c0_133, %c0_134] : memref<2x3xf32, #tpu.memory_space<vmem>>, vector<2x3xf32>
    tpu.vector_store %arg11[%c0_133, %c0_134], %356 {strides = array<i32>} : memref<2x3xf32, #tpu.memory_space<vmem>>, vector<2x3xf32>,
    return
  }
}

</mosaic_0001>

<bundles_post_ra>
// kernel: tpu_custom_call.1
= control target key start
LH: loop header
LB: loop body
LE: loop exit
PB: predicated region body
PF: predicated region fallthrough
CT: control target
= control target key end

     0   :  { %16 = vsyncpa [#allocation3], 0  ;;  %s5103_s0 = inlined_call_operand.hbm [shape: f32[16,16], index: 0, kind: input, shape index: {}]   ;;  %s5104_s1 = inlined_call_operand.hbm [shape: f32[4,16,16], index: 1, kind: input, shape index: {}]   ;;  %s5105_s2 = inlined_call_operand.hbm [shape: f32[4,16,16], index: 2, kind: input, shape index: {}]   ;;  %s5106_s3 = inlined_call_operand.hbm [shape: f32[4,1,16], index: 3, kind: input, shape index: {}]   ;;  %s5107_s4 = inlined_call_operand.vmem [shape: f32[3,16,16], index: 4, kind: input, shape index: {}]   ;;  %s5108_s5 = inlined_call_operand.hbm [shape: f32[3,1,16], index: 5, kind: input, shape index: {}]   ;;  %s5109_s6 = inlined_call_operand.hbm [shape: f32[16,32], index: 6, kind: input, shape index: {}]   ;;  %s5110_s7 = inlined_call_operand.hbm [shape: f32[16,32], index: 7, kind: input, shape index: {}]   ;;  %s5111_s8 = inlined_call_operand.vmem [shape: f32[1,32], index: 8, kind: input, shape index: {}]   ;;  %s5112_s9 = inlined_call_operand.vmem [shape: f32[32,3], index: 9, kind: input, shape index: {}]   ;;  %s5113_s10 = inlined_call_operand.vmem [shape: f32[1,3], index: 10, kind: input, shape index: {}]   ;;  %s5114_s11 = inlined_call_operand.hbm [shape: f32[2,3], index: 11, kind: output, shape index: {}]  }
   0x1   :  { %17 = vsyncpa [#allocation6], 0 }
   0x2   :  { %18 = vsyncpa [#allocation9], 0 }
   0x3   :  { %19 = vsyncpa [#allocation12], 0 }
   0x4   :  { %20 = vsyncpa [#allocation4], 0  ;;  %s4594_s17 = smov [#allocation5]   ;;  %s4595_s19 = smov [#allocation8]  }
   0x5   :  { %s38_s18 = sshll.u32 %s4594_s17, 4  ;;  %s62_s20 = sshll.u32 %s4595_s19, 4  ;;  %s39_s18 = int_to_ptr.vmem [resolvable:$true] %s38_s18  ;;  %s4669_s20 = int_to_ptr.vmem [resolvable:$true] %s62_s20 }
   0x6   :  { %s4408_s23 = scalar_lea.hbm %s5104_s1, 1024 }
   0x7   :  { %p4409_p0 = scmp.ne.s32.totalorder %s5104_s1, %s4408_s23  ;;  %p4412_p1 = scmp.lt.u32.totalorder %s4408_s23, %s5104_s1 }
   0x9   :  { %p4414_p2 = pnand %p4412_p1, %p4409_p0 }
   0xb   :  { %4417 = shalt.err (!%p4414_p2)
}
   0xc   :  { %s4418_s28 = scalar_lea.vmem %s39_s18, 1024  ;;  %p4423_p4 = scmp.lt.s32.totalorder %s39_s18, %s39_s18 }
   0xd   :  { %p4419_p3 = scmp.ne.s32.totalorder %s39_s18, %s4418_s28  ;;  %p4424_p5 = scmp.lt.s32.totalorder %s4418_s28, %s4418_s28 }
   0xf   :  { %p4425_p6 = por %p4424_p5, %p4423_p4 }
  0x11   :  { %p4426_p7 = pnand %p4425_p6, %p4419_p3 }
  0x13   :  { %4429 = shalt.err (!%p4426_p7)
}
  0x14   :  { %s4596_s29 = smov 128   ;;  %s4597_s30 = smov 8  }
  0x15   :  { %44 = dma.hbm_to_vmem [thread:$0]  %s5104_s1, 1024, %s39_s18, [#allocation6], %s4596_s29, %s4596_s29, %s4597_s30  }
  0x16   :  { %s4430_s16 = scalar_lea.hbm %s5106_s3, 64 }
  0x17   :  { %p4431_p8 = scmp.ne.s32.totalorder %s5106_s3, %s4430_s16  ;;  %p4434_p9 = scmp.lt.u32.totalorder %s4430_s16, %s5106_s3 }
  0x19   :  { %p4436_p10 = pnand %p4434_p9, %p4431_p8 }
  0x1b   :  { %4439 = shalt.err (!%p4436_p10)
}
  0x1c   :  { %s4440_s23 = scalar_lea.vmem %s4669_s20, 64  ;;  %p4445_p12 = scmp.lt.s32.totalorder %s4669_s20, %s4669_s20 }
  0x1d   :  { %p4441_p11 = scmp.ne.s32.totalorder %s4669_s20, %s4440_s23  ;;  %p4446_p13 = scmp.lt.s32.totalorder %s4440_s23, %s4440_s23 }
  0x1f   :  { %p4447_p0 = por %p4446_p13, %p4445_p12 }
  0x21   :  { %p4448_p1 = pnand %p4447_p0, %p4441_p11 }
  0x23   :  { %4451 = shalt.err (!%p4448_p1)
}
  0x24   :  { %s4598_s1 = smov 16   ;;  %s4599_s18 = smov 1  }
  0x25   :  { %68 = dma.hbm_to_vmem [thread:$0]  %s5106_s3, 64, %s4669_s20, [#allocation9], %s4598_s1, %s4598_s1, %s4599_s18  }
  0x26   :  { %s4600_s26 = smov [#allocation11]   ;;  %s4601_s28 = smov [#allocation2]  }
  0x27   :  { %s88_s27 = sshll.u32 %s4600_s26, 4  ;;  %s26_s12 = sshll.u32 %s4601_s28, 4  ;;  %s89_s27 = int_to_ptr.vmem [resolvable:$true] %s88_s27  ;;  %s4706_s12 = int_to_ptr.vmem [resolvable:$true] %s26_s12 }
  0x28   :  { %s4452_s15 = scalar_lea.hbm %s5109_s6, 256 }
  0x29   :  { %p4453_p2 = scmp.ne.s32.totalorder %s5109_s6, %s4452_s15  ;;  %p4456_p3 = scmp.lt.u32.totalorder %s4452_s15, %s5109_s6 }
  0x2b   :  { %p4458_p4 = pnand %p4456_p3, %p4453_p2 }
  0x2d   :  { %4461 = shalt.err (!%p4458_p4)
}
  0x2e   :  { %s4462_s3 = scalar_lea.vmem %s89_s27, 256  ;;  %p4467_p6 = scmp.lt.s32.totalorder %s89_s27, %s89_s27 }
  0x2f   :  { %p4463_p5 = scmp.ne.s32.totalorder %s89_s27, %s4462_s3  ;;  %p4468_p7 = scmp.lt.s32.totalorder %s4462_s3, %s4462_s3 }
  0x31   :  { %p4469_p8 = por %p4468_p7, %p4467_p6 }
  0x33   :  { %p4470_p9 = pnand %p4469_p8, %p4463_p5 }
  0x35   :  { %4473 = shalt.err (!%p4470_p9)
}
  0x36   :  { %94 = dma.hbm_to_vmem [thread:$0]  %s5109_s6, 256, %s89_s27, [#allocation12], %s4596_s29, %s4596_s29, %s4597_s30  }
  0x37   :  { %s4474_s25 = scalar_lea.hbm %s5103_s0, 256 }
  0x38   :  { %p4475_p10 = scmp.ne.s32.totalorder %s5103_s0, %s4474_s25  ;;  %p4478_p11 = scmp.lt.u32.totalorder %s4474_s25, %s5103_s0 }
  0x3a   :  { %p4480_p12 = pnand %p4478_p11, %p4475_p10 }
  0x3c   :  { %4483 = shalt.err (!%p4480_p12)
}
  0x3d   :  { %s4484_s15 = scalar_lea.vmem %s4706_s12, 256  ;;  %p4489_p0 = scmp.lt.s32.totalorder %s4706_s12, %s4706_s12 }
  0x3e   :  { %p4485_p13 = scmp.ne.s32.totalorder %s4706_s12, %s4484_s15  ;;  %p4490_p1 = scmp.lt.s32.totalorder %s4484_s15, %s4484_s15 }
  0x40   :  { %p4491_p2 = por %p4490_p1, %p4489_p0 }
  0x42   :  { %p4492_p3 = pnand %p4491_p2, %p4485_p13 }
  0x44   :  { %4495 = shalt.err (!%p4492_p3)
}
  0x45   :  { %32 = dma.hbm_to_vmem [thread:$0]  %s5103_s0, 256, %s4706_s12, [#allocation3], %s4596_s29, %s4596_s29, %s4597_s30  }
  0x46   :  { %s4602_s16 = smov [#allocation7]   ;;  %s4603_s19 = smov [#allocation10]  }
  0x47   :  { %s50_s17 = sshll.u32 %s4602_s16, 4  ;;  %s76_s21 = sshll.u32 %s4603_s19, 4  ;;  %s51_s17 = int_to_ptr.vmem [resolvable:$true] %s50_s17  ;;  %s4743_s21 = int_to_ptr.vmem [resolvable:$true] %s76_s21 }
  0x48   :  { %s4496_s22 = scalar_lea.hbm %s5105_s2, 1024 }
  0x49   :  { %p4497_p4 = scmp.ne.s32.totalorder %s5105_s2, %s4496_s22  ;;  %p4500_p5 = scmp.lt.u32.totalorder %s4496_s22, %s5105_s2 }
  0x4b   :  { %p4502_p6 = pnand %p4500_p5, %p4497_p4 }
  0x4d   :  { %4505 = shalt.err (!%p4502_p6)
}
  0x4e   :  { %s4506_s0 = scalar_lea.vmem %s51_s17, 1024  ;;  %p4511_p8 = scmp.lt.s32.totalorder %s51_s17, %s51_s17 }
  0x4f   :  { %p4507_p7 = scmp.ne.s32.totalorder %s51_s17, %s4506_s0  ;;  %p4512_p9 = scmp.lt.s32.totalorder %s4506_s0, %s4506_s0 }
  0x51   :  { %p4513_p10 = por %p4512_p9, %p4511_p8 }
  0x53   :  { %p4514_p11 = pnand %p4513_p10, %p4507_p7 }
  0x55   :  { %4517 = shalt.err (!%p4514_p11)
}
  0x56   :  { %56 = dma.hbm_to_vmem [thread:$0]  %s5105_s2, 1024, %s51_s17, [#allocation6], %s4596_s29, %s4596_s29, %s4597_s30  }
  0x57   :  { %s4518_s15 = scalar_lea.hbm %s5108_s5, 48 }
  0x58   :  { %p4519_p12 = scmp.ne.s32.totalorder %s5108_s5, %s4518_s15  ;;  %p4522_p13 = scmp.lt.u32.totalorder %s4518_s15, %s5108_s5 }
  0x5a   :  { %p4524_p0 = pnand %p4522_p13, %p4519_p12 }
  0x5c   :  { %4527 = shalt.err (!%p4524_p0)
}
  0x5d   :  { %s4528_s3 = scalar_lea.vmem %s4743_s21, 48  ;;  %s4532_s2 = scalar_lea.vmem %s4743_s21, 64 }
  0x5e   :  { %p4529_p1 = scmp.ne.s32.totalorder %s4743_s21, %s4528_s3  ;;  %p4533_p2 = scmp.lt.s32.totalorder %s4743_s21, %s4743_s21 }
  0x5f   :  { %p4534_p3 = scmp.lt.s32.totalorder %s4532_s2, %s4528_s3 }
  0x61   :  { %p4535_p4 = por %p4534_p3, %p4533_p2 }
  0x63   :  { %p4536_p5 = pnand %p4535_p4, %p4529_p1 }
  0x65   :  { %4539 = shalt.err (!%p4536_p5)
}
  0x66   :  { %82 = dma.hbm_to_vmem [thread:$0]  %s5108_s5, 48, %s4743_s21, [#allocation9], %s4598_s1, %s4598_s1, %s4599_s18  }
  0x67   :  { %s4604_s22 = smov [#allocation13]   ;;  %s4540_s26 = scalar_lea.hbm %s5110_s7, 256 }
  0x68   :  { %s100_s23 = sshll.u32 %s4604_s22, 4  ;;  %p4541_p6 = scmp.ne.s32.totalorder %s5110_s7, %s4540_s26  ;;  %s101_s23 = int_to_ptr.vmem [resolvable:$true] %s100_s23 }
  0x69   :  { %p4544_p7 = scmp.lt.u32.totalorder %s4540_s26, %s5110_s7 }
  0x6b   :  { %p4546_p8 = pnand %p4544_p7, %p4541_p6 }
  0x6d   :  { %4549 = shalt.err (!%p4546_p8)
}
  0x6e   :  { %s4550_s14 = scalar_lea.vmem %s101_s23, 256  ;;  %p4555_p10 = scmp.lt.s32.totalorder %s101_s23, %s101_s23 }
  0x6f   :  { %p4551_p9 = scmp.ne.s32.totalorder %s101_s23, %s4550_s14  ;;  %p4556_p11 = scmp.lt.s32.totalorder %s4550_s14, %s4550_s14 }
  0x71   :  { %p4557_p12 = por %p4556_p11, %p4555_p10 }
  0x73   :  { %p4558_p13 = pnand %p4557_p12, %p4551_p9 }
  0x75   :  { %4561 = shalt.err (!%p4558_p13)
}
  0x76   :  { %106 = dma.hbm_to_vmem [thread:$0]  %s5110_s7, 256, %s101_s23, [#allocation12], %s4596_s29, %s4596_s29, %s4597_s30  }
  0x77   :  { %4584 = dma.done.wait [#allocation3], 256  }
  0x78   :  { %4585 = vsyncadd [#allocation3], 4294967040 }
  0x79   :  { %4586 = dma.done.wait [#allocation6], 2048  }
  0x7a   :  { %4587 = vsyncadd [#allocation6], 4294965248 }
  0x7b   :  { %4588 = dma.done.wait [#allocation9], 112  }
  0x7c   :  { %4589 = vsyncadd [#allocation9], 4294967184 }
  0x7d   :  { %4590 = dma.done.wait [#allocation12], 512  }
  0x7e   :  { %4591 = vsyncadd [#allocation12], 4294966784  ;;  %vm145_vm0 = vcmask 130048   ;;  %v136_v0 = vld [vmem:[#allocation5] sm:$0xff]  ;;  %v137_v1 = vld [vmem:[#allocation5 + $0x8] sm:$0xff]  ;;  %v4605_v22 = vmov 0.0|0.0  }
  0x7f   :  { %v228_v2 = vld [vmem:[#allocation5 + $0x10] sm:$0xff]  ;;  %v4120_v3 = vpack.c.bf16 %v137_v1, %v136_v0  ;;  %v229_v4 = vld [vmem:[#allocation5 + $0x18] sm:$0xff]  ;;  %v314_v7 = vld [vmem:[#allocation5 + $0x20] sm:$0xff]  ;;  %vm4606_vm1 = vmmov 0   ;;  %v4607_v26 = vmov 0.0   ;;  %vm3515_vm3 = vcmask 261120  }
  0x80   :  { %v134_v5 = vld [vmem:[#allocation2] sm:$0xff]  ;;  %v4124_v6 = vpack.c.bf16 %v229_v4, %v228_v2  ;;  %v315_v8 = vld [vmem:[#allocation5 + $0x28] sm:$0xff]  ;;  %v401_v11 = vld [vmem:[#allocation5 + $0x38] sm:$0xff]  ;;  %vm3589_vm4 = vcmask 17408  }
  0x81   :  { %3826 = vmatprep.mubr.msk.f32.mxu0 %vm145_vm0, %v134_v5  ;;  %3833 = vmatprep.mubr.msk.f32.mxu1 %vm145_vm0, %v134_v5  ;;  %v400_v9 = vld [vmem:[#allocation5 + $0x30] sm:$0xff]  ;;  %v4128_v10 = vpack.c.bf16 %v315_v8, %v314_v7  ;;  %v4798_v12 = vld [vmem:[#allocation2 + $0x8] sm:$0xff]  ;;  %v485_v14 = vld [vmem:[#allocation7] sm:$0xff] }
  0x82   :  { %4121 = vmatprep.subr.bf16.mxu0 %v4120_v3  ;;  %4125 = vmatprep.subr.bf16.mxu1 %v4124_v6  ;;  %v4132_v13 = vpack.c.bf16 %v401_v11, %v400_v9  ;;  %v486_v15 = vld [vmem:[#allocation7 + $0x8] sm:$0xff]  ;;  %v488_v16 = vld [vmem:[#allocation7 + $0x10] sm:$0xff]  ;;  %v489_v17 = vld [vmem:[#allocation7 + $0x18] sm:$0xff] }
  0x83   :  { %4123 = vmatpush3.bf16.msra.mxu0 %v4120_v3  ;;  %4127 = vmatpush3.bf16.msra.mxu1 %v4124_v6  ;;  %v4804_v18 = vpack.c.bf16 %v486_v15, %v485_v14  ;;  %v4807_v19 = vpack.c.bf16 %v489_v17, %v488_v16  ;;  %v491_v20 = vld [vmem:[#allocation7 + $0x20] sm:$0xff]  ;;  %v492_v21 = vld [vmem:[#allocation7 + $0x28] sm:$0xff]  ;;  %v494_v23 = vld [vmem:[#allocation7 + $0x30] sm:$0xff] }
  0x84   :  { %4129 = vmatprep.subr.bf16.mxu0 %v4128_v10  ;;  %4133 = vmatprep.subr.bf16.mxu1 %v4132_v13  ;;  %v495_v24 = vld [vmem:[#allocation7 + $0x38] sm:$0xff]  ;;  %v4817_v25 = vpack.c.bf16 %v492_v21, %v491_v20  ;;  %v3609_v28 = vld [vmem:[#allocation8] ss:$0 sm:$0xff]  ;;  %v3612_v29 = vld [vmem:[#allocation8 + $0x1] ss:$0 sm:$0xff] }
  0x85   :  { %v4822_v27 = vpack.c.bf16 %v495_v24, %v494_v23  ;;  %v3615_v36 = vld [vmem:[#allocation8 + $0x2] ss:$0 sm:$0xff]  ;;  %v3618_v37 = vld [vmem:[#allocation8 + $0x3] ss:$0 sm:$0xff] }
  0x86   :  { %3827 = vmatmul.mubr.msk.f32.vlgmr.msra.gmra.mrb[0].mxu0 %vm145_vm0, %v4798_v12  ;;  %3834 = vmatmul.mubr.msk.f32.vlgmr.msra.gmra.mrb[0].mxu1 %vm145_vm0, %v4798_v12 }
  0x87   :  { %4131 = vmatpush3.bf16.msra.mxu0 %v4128_v10  ;;  %4135 = vmatpush3.bf16.msra.mxu1 %v4132_v13 }
  0x88   :  { %3840 = vmatprep.mubr.msk.f32.mxu0 %vm145_vm0, %v134_v5  ;;  %3847 = vmatprep.mubr.msk.f32.mxu1 %vm145_vm0, %v134_v5 }
  0x89   :  { %4136 = vmatprep.subr.bf16.mxu0 %v4605_v22  ;;  %4139 = vmatprep.subr.bf16.mxu1 %v4605_v22 }
  0x8a   :  { %3841 = vmatmul.mubr.msk.f32.vlgmr.msra.gmra.mrb[2].mxu0 %vm145_vm0, %v4798_v12  ;;  %3848 = vmatmul.mubr.msk.f32.vlgmr.msra.gmra.mrb[2].mxu1 %vm145_vm0, %v4798_v12 }
  0x8b   :  { %4138 = vmatpush3.bf16.msra.mxu0 %v4804_v18  ;;  %4141 = vmatpush3.bf16.msra.mxu1 %v4807_v19 }
  0x8c   :  { %3854 = vmatprep.mubr.msk.f32.mxu0 %vm4606_vm1, %v4607_v26  ;;  %3861 = vmatprep.mubr.msk.f32.mxu1 %vm4606_vm1, %v4607_v26 }
  0x8d   :  { %4142 = vmatprep.subr.bf16.mxu0 %v4605_v22  ;;  %4145 = vmatprep.subr.bf16.mxu1 %v4605_v22 }
  0x8e   :  { %3855 = vmatmul.mubr.f32.vlgmr.msra.gmra.mrb[4].mxu0 %v4607_v26  ;;  %3862 = vmatmul.mubr.f32.vlgmr.msra.gmra.mrb[4].mxu1 %v4607_v26 }
  0x8f   :  { %4144 = vmatpush3.bf16.msra.mxu0 %v4817_v25  ;;  %4147 = vmatpush3.bf16.msra.mxu1 %v4822_v27 }
  0x90   :  { %3868 = vmatprep.mubr.msk.f32.mxu0 %vm4606_vm1, %v4607_v26  ;;  %3875 = vmatprep.mubr.msk.f32.mxu1 %vm4606_vm1, %v4607_v26 }
  0x91   :  { %4148 = vmatprep.subr.bf16.mxu0 %v4605_v22  ;;  %4151 = vmatprep.subr.bf16.mxu1 %v4605_v22 }
  0x92   :  { %3869 = vmatmul.mubr.f32.vlgmr.msra.gmra.mrb[6].mxu0 %v4607_v26  ;;  %3876 = vmatmul.mubr.f32.vlgmr.msra.gmra.mrb[6].mxu1 %v4607_v26 }
  0x93   :  { %4150 = vmatpush3.bf16.msra.mxu0 %v4804_v18  ;;  %4153 = vmatpush3.bf16.msra.mxu1 %v4807_v19 }
  0x94   :  { %3882 = vmatprep.mubr.msk.f32.mxu0 %vm4606_vm1, %v4607_v26  ;;  %3889 = vmatprep.mubr.msk.f32.mxu1 %vm4606_vm1, %v4607_v26 }
  0x95   :  { %4154 = vmatprep.subr.bf16.mxu0 %v4605_v22  ;;  %4157 = vmatprep.subr.bf16.mxu1 %v4605_v22 }
 0x159   :  { %v3828_v30 = vpop.f32.mrb[0].mxu0  ;;  %v3835_v32 = vpop.f32.mrb[0].mxu1 }
 0x15a   :  { %v4848_v31 = vadd.f32 %v3828_v30, %v3609_v28  ;;  %v218_v33 = vpop.f32.mrb[1].mxu0  ;;  %v4850_v34 = vadd.f32 %v3835_v32, %v3612_v29  ;;  %v304_v35 = vpop.f32.mrb[1].mxu1 }
 0x15b   :  { %v4856_v44 = vadd.f32 %v3609_v28, %v218_v33  ;;  %v4858_v45 = vadd.f32 %v3612_v29, %v304_v35 }
 0x15d   :  { %v3842_v38 = vpop.f32.mrb[2].mxu0  ;;  %v3849_v40 = vpop.f32.mrb[2].mxu1 }
 0x15e   :  { %v4852_v39 = vadd.f32 %v3842_v38, %v3615_v36  ;;  %v390_v41 = vpop.f32.mrb[3].mxu0  ;;  %v4854_v42 = vadd.f32 %v3849_v40, %v3618_v37  ;;  %v476_v43 = vpop.f32.mrb[3].mxu1 }
 0x15f   :  { %v4862_v57 = vadd.f32 %v3618_v37, %v476_v43  ;;  %v4865_v60 = vadd.f32 %v3615_v36, %v390_v41 }
 0x161   :  { %v565_v46 = vpop.f32.mrb[4].mxu0  ;;  %v636_v48 = vpop.f32.mrb[4].mxu1 }
 0x162   :  { %v569_v47 = vadd.f32 %v565_v46, %v4856_v44  ;;  %v3856_v49 = vpop.f32.mrb[5].mxu0  ;;  %v640_v50 = vadd.f32 %v636_v48, %v4858_v45  ;;  %v3863_v51 = vpop.f32.mrb[5].mxu1 }
 0x164   :  { %v3621_v52 = vmul.f32 -1.442695, %v569_v47  ;;  %v3622_v53 = vmul.f32 -1.442695, %v640_v50 }
 0x165   :  { %v707_v54 = vpop.f32.mrb[6].mxu0  ;;  %v778_v55 = vpop.f32.mrb[6].mxu1 }
 0x166   :  { %4268 = vpow2.f32 %v3621_v52  ;;  %v3870_v56 = vpop.f32.mrb[7].mxu0  ;;  %v3877_v58 = vpop.f32.mrb[7].mxu1  ;;  %v782_v59 = vadd.f32 %v778_v55, %v4862_v57  ;;  %v711_v62 = vadd.f32 %v707_v54, %v4865_v60 }
 0x167   :  { %4270 = vpow2.f32 %v3622_v53 }
 0x168   :  { %v3623_v61 = vmul.f32 -1.442695, %v782_v59 }
 0x16a   :  { %4272 = vpow2.f32 %v3623_v61 }
 0x16b   :  { %4274 = vtanh.f32 %v711_v62 }
 0x170   :  { %v4269_v63 = vpop.eup %4268 }
 0x171   :  { %v4271_v0 = vpop.eup %4270  ;;  %v786_v1 = vadd.f32 1.0, %v4269_v63 }
 0x172   :  { %v792_v2 = vadd.f32 1.0, %v4271_v0 }
 0x173   :  { %4276 = vrcp.f32 %v786_v1 }
 0x174   :  { %4278 = vrcp.f32 %v792_v2  ;;  %v4273_v3 = vpop.eup %4272 }
 0x175   :  { %v4275_v4 = vpop.eup %4274  ;;  %v799_v8 = vadd.f32 1.0, %v4273_v3 }
 0x177   :  { %4280 = vrcp.f32 %v799_v8 }
 0x17d   :  { %v4277_v5 = vpop.eup %4276 }
 0x17e   :  { %v4279_v6 = vpop.eup %4278  ;;  %v803_v7 = vmul.f32 %v4277_v5, %v4275_v4 }
 0x17f   :  { %v802_v9 = vmul.f32 0.0, %v4279_v6 }
 0x181   :  { %v804_v10 = vadd.f32 %v803_v7, %v802_v9  ;;  %v4281_v11 = vpop.eup %4280 }
 0x183   :  { %4282 = vtanh.f32 %v804_v10  ;;  %v1126_v53 = vrot.slane %v804_v10, 6 }
 0x18d   :  { %v4283_v13 = vpop.eup %4282 }
 0x18e   :  { %v806_v14 = vmul.f32 %v4283_v13, %v4281_v11 }
 0x190   :  { %3883 = vmatmul.mubr.msk.f32.vlgmr.msra.gmra.mrb[8].mxu0 %vm145_vm0, %v806_v14  ;;  %3890 = vmatmul.mubr.msk.f32.vlgmr.msra.gmra.mrb[8].mxu1 %vm145_vm0, %v806_v14 }
 0x191   :  { %4156 = vmatpush3.bf16.msra.mxu0 %v4817_v25  ;;  %4159 = vmatpush3.bf16.msra.mxu1 %v4822_v27 }
 0x192   :  { %3896 = vmatprep.mubr.msk.f32.mxu0 %vm4606_vm1, %v4607_v26  ;;  %3903 = vmatprep.mubr.msk.f32.mxu1 %vm4606_vm1, %v4607_v26 }
 0x193   :  { %4160 = vmatprep.subr.bf16.mxu0 %v4605_v22  ;;  %4163 = vmatprep.subr.bf16.mxu1 %v4605_v22 }
 0x194   :  { %3897 = vmatmul.mubr.msk.f32.vlgmr.msra.gmra.mrb[10].mxu0 %vm145_vm0, %v806_v14  ;;  %3904 = vmatmul.mubr.msk.f32.vlgmr.msra.gmra.mrb[10].mxu1 %vm145_vm0, %v806_v14 }
 0x195   :  { %4162 = vmatpush3.bf16.msra.mxu0 %v4804_v18  ;;  %4165 = vmatpush3.bf16.msra.mxu1 %v4807_v19 }
 0x196   :  { %3910 = vmatprep.mubr.msk.f32.mxu0 %vm4606_vm1, %v4607_v26  ;;  %3917 = vmatprep.mubr.msk.f32.mxu1 %vm4606_vm1, %v4607_v26 }
 0x197   :  { %4166 = vmatprep.subr.bf16.mxu0 %v4605_v22  ;;  %4169 = vmatprep.subr.bf16.mxu1 %v4605_v22 }
 0x263   :  { %v876_v15 = vpop.f32.mrb[8].mxu0  ;;  %v950_v16 = vpop.f32.mrb[8].mxu1 }
 0x264   :  { %v881_v17 = vrot.slane %v876_v15, 6  ;;  %v955_v20 = vrot.slane %v950_v16, 6  ;;  %v3884_v21 = vpop.f32.mrb[9].mxu0  ;;  %v3891_v23 = vpop.f32.mrb[9].mxu1 }
 0x266   :  { %v883_v24 = vadd.f32 %v881_v17, %v4856_v44  ;;  %v957_v28 = vadd.f32 %v955_v20, %v4858_v45 }
 0x267   :  { %v1024_v29 = vpop.f32.mrb[10].mxu0  ;;  %v1098_v30 = vpop.f32.mrb[10].mxu1 }
 0x268   :  { %v3628_v32 = vmul.f32 -1.442695, %v883_v24  ;;  %v3629_v33 = vmul.f32 -1.442695, %v957_v28  ;;  %v1103_v35 = vrot.slane %v1098_v30, 6  ;;  %v3898_v36 = vpop.f32.mrb[11].mxu0 }
 0x269   :  { %v3905_v37 = vpop.f32.mrb[11].mxu1  ;;  %v1029_v40 = vrot.slane %v1024_v29, 6 }
 0x26a   :  { %4284 = vpow2.f32 %v3628_v32  ;;  %v1105_v38 = vadd.f32 %v1103_v35, %v4862_v57 }
 0x26b   :  { %4286 = vpow2.f32 %v3629_v33  ;;  %v1031_v43 = vadd.f32 %v1029_v40, %v4865_v60 }
 0x26c   :  { %v3630_v41 = vmul.f32 -1.442695, %v1105_v38 }
 0x26e   :  { %4288 = vpow2.f32 %v3630_v41 }
 0x26f   :  { %4290 = vtanh.f32 %v1031_v43 }
 0x274   :  { %v4285_v46 = vpop.eup %4284 }
 0x275   :  { %v4287_v47 = vpop.eup %4286  ;;  %v1109_v48 = vadd.f32 1.0, %v4285_v46 }
 0x276   :  { %v1115_v49 = vadd.f32 1.0, %v4287_v47 }
 0x277   :  { %4292 = vrcp.f32 %v1109_v48 }
 0x278   :  { %4294 = vrcp.f32 %v1115_v49  ;;  %v4289_v50 = vpop.eup %4288 }
 0x279   :  { %v4291_v51 = vpop.eup %4290  ;;  %v1122_v56 = vadd.f32 1.0, %v4289_v50 }
 0x27b   :  { %4296 = vrcp.f32 %v1122_v56 }
 0x281   :  { %v4293_v52 = vpop.eup %4292 }
 0x282   :  { %v4295_v54 = vpop.eup %4294  ;;  %v1129_v55 = vmul.f32 %v4293_v52, %v4291_v51 }
 0x283   :  { %v1128_v58 = vmul.f32 %v4295_v54, %v1126_v53 }
 0x285   :  { %v1130_v59 = vadd.f32 %v1129_v55, %v1128_v58  ;;  %v4297_v61 = vpop.eup %4296 }
 0x287   :  { %4298 = vtanh.f32 %v1130_v59  ;;  %v1453_v36 = vrot.slane %v1130_v59, 6 }
 0x291   :  { %v4299_v62 = vpop.eup %4298 }
 0x292   :  { %v1132_v63 = vmul.f32 %v4299_v62, %v4297_v61 }
 0x294   :  { %v1134_v0 = vrot.slane %v1132_v63, 2 }
 0x296   :  { %3911 = vmatmul.mubr.msk.f32.vlgmr.msra.gmra.mrb[12].mxu0 %vm145_vm0, %v1134_v0  ;;  %3918 = vmatmul.mubr.msk.f32.vlgmr.msra.gmra.mrb[12].mxu1 %vm145_vm0, %v1134_v0 }
 0x297   :  { %4168 = vmatpush3.bf16.msra.mxu0 %v4817_v25  ;;  %4171 = vmatpush3.bf16.msra.mxu1 %v4822_v27 }
 0x298   :  { %3924 = vmatprep.mubr.msk.f32.mxu0 %vm4606_vm1, %v4607_v26  ;;  %3931 = vmatprep.mubr.msk.f32.mxu1 %vm4606_vm1, %v4607_v26 }
 0x299   :  { %4172 = vmatprep.subr.bf16.mxu0 %v4605_v22  ;;  %4175 = vmatprep.subr.bf16.mxu1 %v4605_v22 }
 0x29a   :  { %3925 = vmatmul.mubr.msk.f32.vlgmr.msra.gmra.mrb[14].mxu0 %vm145_vm0, %v1134_v0  ;;  %3932 = vmatmul.mubr.msk.f32.vlgmr.msra.gmra.mrb[14].mxu1 %vm145_vm0, %v1134_v0 }
 0x29b   :  { %4174 = vmatpush3.bf16.msra.mxu0 %v4804_v18  ;;  %4177 = vmatpush3.bf16.msra.mxu1 %v4807_v19 }
 0x29c   :  { %3938 = vmatprep.mubr.msk.f32.mxu0 %vm4606_vm1, %v4607_v26  ;;  %3945 = vmatprep.mubr.msk.f32.mxu1 %vm4606_vm1, %v4607_v26 }
 0x29d   :  { %4178 = vmatprep.subr.bf16.mxu0 %v4605_v22  ;;  %4181 = vmatprep.subr.bf16.mxu1 %v4605_v22 }
 0x369   :  { %v1203_v1 = vpop.f32.mrb[12].mxu0  ;;  %v1277_v2 = vpop.f32.mrb[12].mxu1 }
 0x36a   :  { %v1208_v3 = vrot.slane %v1203_v1, 4  ;;  %v1282_v4 = vrot.slane %v1277_v2, 4  ;;  %v3912_v5 = vpop.f32.mrb[13].mxu0  ;;  %v3919_v6 = vpop.f32.mrb[13].mxu1 }
 0x36c   :  { %v1210_v7 = vadd.f32 %v1208_v3, %v4856_v44  ;;  %v1284_v8 = vadd.f32 %v1282_v4, %v4858_v45 }
 0x36d   :  { %v1351_v9 = vpop.f32.mrb[14].mxu0  ;;  %v1425_v10 = vpop.f32.mrb[14].mxu1 }
 0x36e   :  { %v3635_v11 = vmul.f32 -1.442695, %v1210_v7  ;;  %v3636_v13 = vmul.f32 -1.442695, %v1284_v8  ;;  %v1430_v14 = vrot.slane %v1425_v10, 4  ;;  %v3926_v15 = vpop.f32.mrb[15].mxu0 }
 0x36f   :  { %v3933_v16 = vpop.f32.mrb[15].mxu1  ;;  %v1356_v20 = vrot.slane %v1351_v9, 4 }
 0x370   :  { %4300 = vpow2.f32 %v3635_v11  ;;  %v1432_v17 = vadd.f32 %v1430_v14, %v4862_v57 }
 0x371   :  { %4302 = vpow2.f32 %v3636_v13  ;;  %v1358_v23 = vadd.f32 %v1356_v20, %v4865_v60 }
 0x372   :  { %v3637_v21 = vmul.f32 -1.442695, %v1432_v17 }
 0x374   :  { %4304 = vpow2.f32 %v3637_v21 }
 0x375   :  { %4306 = vtanh.f32 %v1358_v23 }
 0x37a   :  { %v4301_v24 = vpop.eup %4300 }
 0x37b   :  { %v4303_v28 = vpop.eup %4302  ;;  %v1436_v29 = vadd.f32 1.0, %v4301_v24 }
 0x37c   :  { %v1442_v30 = vadd.f32 1.0, %v4303_v28 }
 0x37d   :  { %4308 = vrcp.f32 %v1436_v29 }
 0x37e   :  { %4310 = vrcp.f32 %v1442_v30  ;;  %v4305_v32 = vpop.eup %4304 }
 0x37f   :  { %v4307_v33 = vpop.eup %4306  ;;  %v1449_v40 = vadd.f32 1.0, %v4305_v32 }
 0x381   :  { %4312 = vrcp.f32 %v1449_v40 }
 0x387   :  { %v4309_v35 = vpop.eup %4308 }
 0x388   :  { %v4311_v37 = vpop.eup %4310  ;;  %v1456_v38 = vmul.f32 %v4309_v35, %v4307_v33 }
 0x389   :  { %v1455_v41 = vmul.f32 %v4311_v37, %v1453_v36 }
 0x38b   :  { %v1457_v43 = vadd.f32 %v1456_v38, %v1455_v41  ;;  %v4313_v46 = vpop.eup %4312 }
 0x38d   :  { %4314 = vtanh.f32 %v1457_v43  ;;  %v1780_v13 = vrot.slane %v1457_v43, 6 }
 0x397   :  { %v4315_v47 = vpop.eup %4314 }
 0x398   :  { %v1459_v48 = vmul.f32 %v4315_v47, %v4313_v46 }
 0x39a   :  { %v1461_v49 = vrot.slane %v1459_v48, 4 }
 0x39c   :  { %3939 = vmatmul.mubr.msk.f32.vlgmr.msra.gmra.mrb[16].mxu0 %vm145_vm0, %v1461_v49  ;;  %3946 = vmatmul.mubr.msk.f32.vlgmr.msra.gmra.mrb[16].mxu1 %vm145_vm0, %v1461_v49 }
 0x39d   :  { %4180 = vmatpush3.bf16.msra.mxu0 %v4817_v25  ;;  %4183 = vmatpush3.bf16.msra.mxu1 %v4822_v27 }
 0x39e   :  { %3952 = vmatprep.mubr.msk.f32.mxu0 %vm4606_vm1, %v4607_v26  ;;  %3959 = vmatprep.mubr.msk.f32.mxu1 %vm4606_vm1, %v4607_v26 }
 0x39f   :  { %4184 = vmatprep.subr.bf16.mxu0 %v4605_v22  ;;  %4187 = vmatprep.subr.bf16.mxu1 %v4605_v22 }
 0x3a0   :  { %3953 = vmatmul.mubr.msk.f32.vlgmr.msra.gmra.mrb[18].mxu0 %vm145_vm0, %v1461_v49  ;;  %3960 = vmatmul.mubr.msk.f32.vlgmr.msra.gmra.mrb[18].mxu1 %vm145_vm0, %v1461_v49 }
 0x3a1   :  { %4186 = vmatpush3.bf16.msra.mxu0 %v4804_v18  ;;  %4189 = vmatpush3.bf16.msra.mxu1 %v4807_v19 }
 0x3a2   :  { %3966 = vmatprep.mubr.msk.f32.mxu0 %vm4606_vm1, %v4607_v26  ;;  %3973 = vmatprep.mubr.msk.f32.mxu1 %vm4606_vm1, %v4607_v26 }
 0x3a3   :  { %4190 = vmatprep.subr.bf16.mxu0 %v4605_v22  ;;  %4193 = vmatprep.subr.bf16.mxu1 %v4605_v22 }
 0x46f   :  { %v1530_v50 = vpop.f32.mrb[16].mxu0  ;;  %v1604_v51 = vpop.f32.mrb[16].mxu1 }
 0x470   :  { %v1535_v52 = vrot.slane %v1530_v50, 2  ;;  %v1609_v53 = vrot.slane %v1604_v51, 2  ;;  %v3940_v54 = vpop.f32.mrb[17].mxu0  ;;  %v3947_v55 = vpop.f32.mrb[17].mxu1 }
 0x472   :  { %v1537_v56 = vadd.f32 %v1535_v52, %v4856_v44  ;;  %v1611_v58 = vadd.f32 %v1609_v53, %v4858_v45 }
 0x473   :  { %v1678_v59 = vpop.f32.mrb[18].mxu0  ;;  %v1752_v61 = vpop.f32.mrb[18].mxu1 }
 0x474   :  { %v3642_v62 = vmul.f32 -1.442695, %v1537_v56  ;;  %v3643_v63 = vmul.f32 -1.442695, %v1611_v58  ;;  %v1757_v0 = vrot.slane %v1752_v61, 2  ;;  %v3954_v1 = vpop.f32.mrb[19].mxu0 }
 0x475   :  { %v3961_v2 = vpop.f32.mrb[19].mxu1  ;;  %v1683_v4 = vrot.slane %v1678_v59, 2 }
 0x476   :  { %4316 = vpow2.f32 %v3642_v62  ;;  %v1759_v3 = vadd.f32 %v1757_v0, %v4862_v57 }
 0x477   :  { %4318 = vpow2.f32 %v3643_v63  ;;  %v1685_v6 = vadd.f32 %v1683_v4, %v4865_v60 }
 0x478   :  { %v3644_v5 = vmul.f32 -1.442695, %v1759_v3 }
 0x47a   :  { %4320 = vpow2.f32 %v3644_v5 }
 0x47b   :  { %4322 = vtanh.f32 %v1685_v6 }
 0x480   :  { %v4317_v7 = vpop.eup %4316 }
 0x481   :  { %v4319_v8 = vpop.eup %4318  ;;  %v1763_v44 = vadd.f32 1.0, %v4317_v7 }
 0x482   :  { %v1769_v45 = vadd.f32 1.0, %v4319_v8 }
 0x483   :  { %4324 = vrcp.f32 %v1763_v44 }
 0x484   :  { %4326 = vrcp.f32 %v1769_v45  ;;  %v4321_v9 = vpop.eup %4320 }
 0x485   :  { %v4323_v10 = vpop.eup %4322  ;;  %v1776_v16 = vadd.f32 1.0, %v4321_v9 }
 0x487   :  { %4328 = vrcp.f32 %v1776_v16 }
 0x48d   :  { %v4325_v11 = vpop.eup %4324 }
 0x48e   :  { %v4327_v14 = vpop.eup %4326  ;;  %v1783_v15 = vmul.f32 %v4325_v11, %v4323_v10 }
 0x48f   :  { %v1782_v57 = vmul.f32 %v4327_v14, %v1780_v13 }
 0x491   :  { %v1784_v17 = vadd.f32 %v1783_v15, %v1782_v57  ;;  %v4329_v60 = vpop.eup %4328 }
 0x493   :  { %4330 = vtanh.f32 %v1784_v17  ;;  %v2095_v55 = vrot.slane %v1784_v17, 6 }
 0x49d   :  { %v4331_v20 = vpop.eup %4330 }
 0x49e   :  { %v1786_v21 = vmul.f32 %v4331_v20, %v4329_v60 }
 0x4a0   :  { %v1788_v23 = vrot.slane %v1786_v21, 6 }
 0x4a2   :  { %3967 = vmatmul.mubr.msk.f32.vlgmr.msra.gmra.mrb[20].mxu0 %vm145_vm0, %v1788_v23  ;;  %3974 = vmatmul.mubr.msk.f32.vlgmr.msra.gmra.mrb[20].mxu1 %vm145_vm0, %v1788_v23 }
 0x4a3   :  { %4192 = vmatpush3.bf16.msra.mxu0 %v4817_v25  ;;  %4195 = vmatpush3.bf16.msra.mxu1 %v4822_v27 }
 0x4a4   :  { %3980 = vmatprep.mubr.msk.f32.mxu0 %vm4606_vm1, %v4607_v26  ;;  %3987 = vmatprep.mubr.msk.f32.mxu1 %vm4606_vm1, %v4607_v26 }
 0x4a5   :  { %4196 = vmatprep.subr.bf16.mxu0 %v4605_v22  ;;  %4199 = vmatprep.subr.bf16.mxu1 %v4605_v22 }
 0x4a6   :  { %3981 = vmatmul.mubr.msk.f32.vlgmr.msra.gmra.mrb[22].mxu0 %vm145_vm0, %v1788_v23  ;;  %3988 = vmatmul.mubr.msk.f32.vlgmr.msra.gmra.mrb[22].mxu1 %vm145_vm0, %v1788_v23 }
 0x4a7   :  { %4198 = vmatpush3.bf16.msra.mxu0 %v4804_v18  ;;  %4201 = vmatpush3.bf16.msra.mxu1 %v4807_v19 }
 0x4a8   :  { %3994 = vmatprep.mubr.msk.f32.mxu0 %vm4606_vm1, %v4607_v26  ;;  %4001 = vmatprep.mubr.msk.f32.mxu1 %vm4606_vm1, %v4607_v26 }
 0x4a9   :  { %4202 = vmatprep.subr.bf16.mxu0 %v4605_v22  ;;  %4205 = vmatprep.subr.bf16.mxu1 %v4605_v22 }
 0x575   :  { %v1857_v24 = vpop.f32.mrb[20].mxu0  ;;  %v1928_v28 = vpop.f32.mrb[20].mxu1 }
 0x576   :  { %v1861_v29 = vadd.f32 %v1857_v24, %v4848_v31  ;;  %v1932_v30 = vadd.f32 %v1928_v28, %v4850_v34  ;;  %v3968_v32 = vpop.f32.mrb[21].mxu0  ;;  %v3975_v33 = vpop.f32.mrb[21].mxu1 }
 0x578   :  { %v3649_v35 = vmul.f32 -1.442695, %v1861_v29  ;;  %v3650_v36 = vmul.f32 -1.442695, %v1932_v30 }
 0x579   :  { %v1999_v37 = vpop.f32.mrb[22].mxu0  ;;  %v2070_v38 = vpop.f32.mrb[22].mxu1 }
 0x57a   :  { %4332 = vpow2.f32 %v3649_v35  ;;  %v3982_v40 = vpop.f32.mrb[23].mxu0  ;;  %v3989_v41 = vpop.f32.mrb[23].mxu1  ;;  %v2074_v43 = vadd.f32 %v2070_v38, %v4854_v42  ;;  %v2003_v47 = vadd.f32 %v1999_v37, %v4852_v39 }
 0x57b   :  { %4334 = vpow2.f32 %v3650_v36 }
 0x57c   :  { %v3651_v46 = vmul.f32 -1.442695, %v2074_v43 }
 0x57e   :  { %4336 = vpow2.f32 %v3651_v46 }
 0x57f   :  { %4338 = vtanh.f32 %v2003_v47 }
 0x584   :  { %v4333_v48 = vpop.eup %4332 }
 0x585   :  { %v4335_v49 = vpop.eup %4334  ;;  %v2078_v50 = vadd.f32 1.0, %v4333_v48 }
 0x586   :  { %v2084_v51 = vadd.f32 1.0, %v4335_v49 }
 0x587   :  { %4340 = vrcp.f32 %v2078_v50 }
 0x588   :  { %4342 = vrcp.f32 %v2084_v51  ;;  %v4337_v52 = vpop.eup %4336 }
 0x589   :  { %v4339_v53 = vpop.eup %4338  ;;  %v2091_v59 = vadd.f32 1.0, %v4337_v52 }
 0x58b   :  { %4344 = vrcp.f32 %v2091_v59 }
 0x591   :  { %v4341_v54 = vpop.eup %4340 }
 0x592   :  { %v4343_v56 = vpop.eup %4342  ;;  %v2098_v58 = vmul.f32 %v4341_v54, %v4339_v53 }
 0x593   :  { %v2097_v61 = vmul.f32 %v4343_v56, %v2095_v55 }
 0x595   :  { %v2099_v62 = vadd.f32 %v2098_v58, %v2097_v61  ;;  %v4345_v63 = vpop.eup %4344 }
 0x597   :  { %4346 = vtanh.f32 %v2099_v62  ;;  %v2421_v32 = vrot.slane %v2099_v62, 6 }
 0x5a1   :  { %v4347_v0 = vpop.eup %4346 }
 0x5a2   :  { %v2101_v1 = vmul.f32 %v4347_v0, %v4345_v63 }
 0x5a4   :  { %3995 = vmatmul.mubr.msk.f32.vlgmr.msra.gmra.mrb[24].mxu0 %vm145_vm0, %v2101_v1  ;;  %4002 = vmatmul.mubr.msk.f32.vlgmr.msra.gmra.mrb[24].mxu1 %vm145_vm0, %v2101_v1 }
 0x5a5   :  { %4204 = vmatpush3.bf16.msra.mxu0 %v4817_v25  ;;  %4207 = vmatpush3.bf16.msra.mxu1 %v4822_v27 }
 0x5a6   :  { %4008 = vmatprep.mubr.msk.f32.mxu0 %vm4606_vm1, %v4607_v26  ;;  %4015 = vmatprep.mubr.msk.f32.mxu1 %vm4606_vm1, %v4607_v26 }
 0x5a7   :  { %4208 = vmatprep.subr.bf16.mxu0 %v4605_v22  ;;  %4211 = vmatprep.subr.bf16.mxu1 %v4605_v22 }
 0x5a8   :  { %4009 = vmatmul.mubr.msk.f32.vlgmr.msra.gmra.mrb[26].mxu0 %vm145_vm0, %v2101_v1  ;;  %4016 = vmatmul.mubr.msk.f32.vlgmr.msra.gmra.mrb[26].mxu1 %vm145_vm0, %v2101_v1 }
 0x5a9   :  { %4210 = vmatpush3.bf16.msra.mxu0 %v4804_v18  ;;  %4213 = vmatpush3.bf16.msra.mxu1 %v4807_v19 }
 0x5aa   :  { %4022 = vmatprep.mubr.msk.f32.mxu0 %vm4606_vm1, %v4607_v26  ;;  %4029 = vmatprep.mubr.msk.f32.mxu1 %vm4606_vm1, %v4607_v26 }
 0x5ab   :  { %4214 = vmatprep.subr.bf16.mxu0 %v4605_v22  ;;  %4217 = vmatprep.subr.bf16.mxu1 %v4605_v22 }
 0x677   :  { %v2171_v2 = vpop.f32.mrb[24].mxu0  ;;  %v2245_v3 = vpop.f32.mrb[24].mxu1 }
 0x678   :  { %v2176_v4 = vrot.slane %v2171_v2, 6  ;;  %v2250_v5 = vrot.slane %v2245_v3, 6  ;;  %v3996_v6 = vpop.f32.mrb[25].mxu0  ;;  %v4003_v7 = vpop.f32.mrb[25].mxu1 }
 0x67a   :  { %v2178_v8 = vadd.f32 %v2176_v4, %v4848_v31  ;;  %v2252_v44 = vadd.f32 %v2250_v5, %v4850_v34 }
 0x67b   :  { %v2319_v45 = vpop.f32.mrb[26].mxu0  ;;  %v2393_v9 = vpop.f32.mrb[26].mxu1 }
 0x67c   :  { %v3656_v10 = vmul.f32 -1.442695, %v2178_v8  ;;  %v3657_v11 = vmul.f32 -1.442695, %v2252_v44  ;;  %v2398_v13 = vrot.slane %v2393_v9, 6  ;;  %v4010_v14 = vpop.f32.mrb[27].mxu0 }
 0x67d   :  { %v4017_v15 = vpop.f32.mrb[27].mxu1  ;;  %v2324_v57 = vrot.slane %v2319_v45, 6 }
 0x67e   :  { %4348 = vpow2.f32 %v3656_v10  ;;  %v2400_v16 = vadd.f32 %v2398_v13, %v4854_v42 }
 0x67f   :  { %4350 = vpow2.f32 %v3657_v11  ;;  %v2326_v60 = vadd.f32 %v2324_v57, %v4852_v39 }
 0x680   :  { %v3658_v17 = vmul.f32 -1.442695, %v2400_v16 }
 0x682   :  { %4352 = vpow2.f32 %v3658_v17  ;;  %v3082_v17 = vld [vmem:[%s5107_s4] sm:$0xff] }
 0x683   :  { %4354 = vtanh.f32 %v2326_v60  ;;  %v3083_v60 = vld [vmem:[%s5107_s4 + $0x8] sm:$0xff] }
 0x688   :  { %v4349_v20 = vpop.eup %4348 }
 0x689   :  { %v4351_v21 = vpop.eup %4350  ;;  %v2404_v23 = vadd.f32 1.0, %v4349_v20  ;;  %v3675_v20 = vld [vmem:[%s5107_s4 + $0x10] sm:$0xff] }
 0x68a   :  { %v2410_v24 = vadd.f32 1.0, %v4351_v21  ;;  %v3676_v21 = vld [vmem:[%s5107_s4 + $0x18] sm:$0xff] }
 0x68b   :  { %4356 = vrcp.f32 %v2404_v23  ;;  %v4233_v23 = vpack.c.bf16 %v3083_v60, %v3082_v17 }
 0x68c   :  { %4358 = vrcp.f32 %v2410_v24  ;;  %v4353_v28 = vpop.eup %4352  ;;  %v3679_v24 = vld [vmem:[%s5107_s4 + $0x20] sm:$0xff] }
 0x68d   :  { %v4355_v29 = vpop.eup %4354  ;;  %v2417_v36 = vadd.f32 1.0, %v4353_v28  ;;  %v3680_v28 = vld [vmem:[%s5107_s4 + $0x28] sm:$0xff] }
 0x68f   :  { %4360 = vrcp.f32 %v2417_v36 }
 0x695   :  { %v4357_v30 = vpop.eup %4356 }
 0x696   :  { %v4359_v33 = vpop.eup %4358  ;;  %v2424_v35 = vmul.f32 %v4357_v30, %v4355_v29  ;;  %v4236_v29 = vpack.c.bf16 %v3676_v21, %v3675_v20  ;;  %v3343_v30 = vld [vmem:[#allocation11 + $0x8] sm:$0xff] }
 0x697   :  { %v2423_v37 = vmul.f32 %v4359_v33, %v2421_v32  ;;  %v3344_v32 = vld [vmem:[#allocation13] sm:$0xff] }
 0x699   :  { %v2425_v38 = vadd.f32 %v2424_v35, %v2423_v37  ;;  %v4361_v40 = vpop.eup %4360  ;;  %v3345_v35 = vld [vmem:[#allocation13 + $0x8] sm:$0xff] }
 0x69a   :  { %v4242_v36 = vpack.c.bf16 %v3345_v35, %v3344_v32  ;;  %v3504_v35 = vld [vmem:[%s5112_s9] sm:$0xff] }
 0x69b   :  { %4362 = vtanh.f32 %v2425_v38  ;;  %v2748_v44 = vrot.slane %v2425_v38, 6 }
 0x6a5   :  { %v4363_v41 = vpop.eup %4362 }
 0x6a6   :  { %v2427_v43 = vmul.f32 %v4363_v41, %v4361_v40 }
 0x6a8   :  { %v2429_v46 = vrot.slane %v2427_v43, 2 }
 0x6aa   :  { %4023 = vmatmul.mubr.msk.f32.vlgmr.msra.gmra.mrb[28].mxu0 %vm145_vm0, %v2429_v46  ;;  %4030 = vmatmul.mubr.msk.f32.vlgmr.msra.gmra.mrb[28].mxu1 %vm145_vm0, %v2429_v46 }
 0x6ab   :  { %4216 = vmatpush3.bf16.msra.mxu0 %v4817_v25  ;;  %4219 = vmatpush3.bf16.msra.mxu1 %v4822_v27 }
 0x6ac   :  { %4036 = vmatprep.mubr.msk.f32.mxu0 %vm4606_vm1, %v4607_v26  ;;  %4043 = vmatprep.mubr.msk.f32.mxu1 %vm4606_vm1, %v4607_v26 }
 0x6ad   :  { %4220 = vmatprep.subr.bf16.mxu0 %v4605_v22  ;;  %4223 = vmatprep.subr.bf16.mxu1 %v4605_v22 }
 0x6ae   :  { %4037 = vmatmul.mubr.msk.f32.vlgmr.msra.gmra.mrb[30].mxu0 %vm145_vm0, %v2429_v46  ;;  %4044 = vmatmul.mubr.msk.f32.vlgmr.msra.gmra.mrb[30].mxu1 %vm145_vm0, %v2429_v46 }
 0x6af   :  { %4222 = vmatpush3.bf16.msra.mxu0 %v4804_v18  ;;  %4225 = vmatpush3.bf16.msra.mxu1 %v4807_v19 }
 0x6b0   :  { %4050 = vmatprep.mubr.msk.f32.mxu0 %vm4606_vm1, %v4607_v26  ;;  %4057 = vmatprep.mubr.msk.f32.mxu1 %vm4606_vm1, %v4607_v26 }
 0x6b1   :  { %4226 = vmatprep.subr.bf16.mxu0 %v4605_v22  ;;  %4229 = vmatprep.subr.bf16.mxu1 %v4605_v22 }
 0x77d   :  { %v2498_v47 = vpop.f32.mrb[28].mxu0  ;;  %v2572_v48 = vpop.f32.mrb[28].mxu1 }
 0x77e   :  { %v2503_v49 = vrot.slane %v2498_v47, 4  ;;  %v2577_v50 = vrot.slane %v2572_v48, 4  ;;  %v4024_v51 = vpop.f32.mrb[29].mxu0  ;;  %v4031_v52 = vpop.f32.mrb[29].mxu1 }
 0x780   :  { %v2505_v18 = vadd.f32 %v2503_v49, %v4848_v31  ;;  %v2579_v19 = vadd.f32 %v2577_v50, %v4850_v34 }
 0x781   :  { %v2646_v53 = vpop.f32.mrb[30].mxu0  ;;  %v2720_v54 = vpop.f32.mrb[30].mxu1 }
 0x782   :  { %v3663_v55 = vmul.f32 -1.442695, %v2505_v18  ;;  %v3664_v56 = vmul.f32 -1.442695, %v2579_v19  ;;  %v2725_v58 = vrot.slane %v2720_v54, 4  ;;  %v4038_v59 = vpop.f32.mrb[31].mxu0 }
 0x783   :  { %v4045_v61 = vpop.f32.mrb[31].mxu1  ;;  %v2651_v63 = vrot.slane %v2646_v53, 4  ;;  %v3673_v54 = vld [vmem:[#allocation10] ss:$0 sm:$0xff] }
 0x784   :  { %4364 = vpow2.f32 %v3663_v55  ;;  %v2727_v62 = vadd.f32 %v2725_v58, %v4854_v42 }
 0x785   :  { %4366 = vpow2.f32 %v3664_v56  ;;  %v2653_v1 = vadd.f32 %v2651_v63, %v4852_v39 }
 0x786   :  { %v3665_v0 = vmul.f32 -1.442695, %v2727_v62  ;;  %v3681_v62 = vld [vmem:[#allocation10 + $0x2] ss:$0 sm:$0xff] }
 0x788   :  { %4368 = vpow2.f32 %v3665_v0 }
 0x789   :  { %4370 = vtanh.f32 %v2653_v1 }
 0x78e   :  { %v4365_v2 = vpop.eup %4364 }
 0x78f   :  { %v4367_v3 = vpop.eup %4366  ;;  %v2731_v4 = vadd.f32 1.0, %v4365_v2 }
 0x790   :  { %v2737_v5 = vadd.f32 1.0, %v4367_v3 }
 0x791   :  { %4372 = vrcp.f32 %v2731_v4 }
 0x792   :  { %4374 = vrcp.f32 %v2737_v5  ;;  %v4369_v6 = vpop.eup %4368 }
 0x793   :  { %v4371_v7 = vpop.eup %4370  ;;  %v2744_v10 = vadd.f32 1.0, %v4369_v6 }
 0x795   :  { %4376 = vrcp.f32 %v2744_v10 }
 0x79b   :  { %v4373_v8 = vpop.eup %4372 }
 0x79c   :  { %v4375_v45 = vpop.eup %4374  ;;  %v2751_v9 = vmul.f32 %v4373_v8, %v4371_v7  ;;  %v3677_v7 = vld [vmem:[#allocation10 + $0x1] ss:$0 sm:$0xff] }
 0x79d   :  { %v2750_v11 = vmul.f32 %v4375_v45, %v2748_v44 }
 0x79f   :  { %v5012_v13 = vadd.f32 %v2751_v9, %v2750_v11  ;;  %v4377_v14 = vpop.eup %4376 }
 0x7a1   :  { %4378 = vtanh.f32 %v5012_v13 }
 0x7ab   :  { %v4379_v15 = vpop.eup %4378 }
 0x7ac   :  { %v2754_v16 = vmul.f32 %v4379_v15, %v4377_v14 }
 0x7ae   :  { %v2756_v57 = vrot.slane %v2754_v16, 4  ;;  %v3075_v16 = vrot.slane %v5012_v13, 6 }
 0x7b0   :  { %4051 = vmatmul.mubr.msk.f32.vlgmr.msra.gmra.mrb[32].mxu0 %vm145_vm0, %v2756_v57  ;;  %4058 = vmatmul.mubr.msk.f32.vlgmr.msra.gmra.mrb[32].mxu1 %vm145_vm0, %v2756_v57 }
 0x7b1   :  { %4228 = vmatpush3.bf16.msra.mxu0 %v4817_v25  ;;  %4231 = vmatpush3.bf16.msra.mxu1 %v4822_v27  ;;  %v3091_v25 = vrot.slane %v4798_v12, 6  ;;  %v4239_v27 = vpack.c.bf16 %v3680_v28, %v3679_v24  ;;  %v3342_v12 = vld [vmem:[#allocation11] sm:$0xff] }
 0x7b2   :  { %4064 = vmatprep.mubr.msk.f32.mxu0 %vm4606_vm1, %v4607_v26  ;;  %4071 = vmatprep.mubr.msk.f32.mxu1 %vm4606_vm1, %v4607_v26  ;;  %v4245_v33 = vpack.c.bf16 %v3343_v30, %v3342_v12 }
 0x7b3   :  { %4232 = vmatprep.subr.bf16.mxu0 %v4605_v22  ;;  %4235 = vmatprep.subr.bf16.mxu1 %v4605_v22 }
 0x7b4   :  { %4065 = vmatmul.mubr.msk.f32.vlgmr.msra.gmra.mrb[34].mxu0 %vm145_vm0, %v2756_v57  ;;  %4072 = vmatmul.mubr.msk.f32.vlgmr.msra.gmra.mrb[34].mxu1 %vm145_vm0, %v2756_v57 }
 0x7b5   :  { %4234 = vmatpush3.bf16.msra.mxu0 %v4233_v23  ;;  %4078 = vmatprep.mubr.msk.f32.mxu0 %vm4606_vm1, %v4607_v26 }
 0x7b6   :  { %4238 = vmatprep.subr.bf16.mxu0 %v4605_v22  ;;  %4237 = vmatpush3.bf16.msra.mxu1 %v4236_v29 }
 0x7b7   :  { %4085 = vmatprep.mubr.msk.f32.mxu1 %vm4606_vm1, %v4607_v26  ;;  %4241 = vmatprep.subr.bf16.mxu1 %v4605_v22 }
 0x7b8   :  { %4079 = vmatmul.mubr.msk.f32.vlgmr.msra.gmra.mrb[36].mxu0 %vm145_vm0, %v3091_v25 }
 0x7b9   :  { %4240 = vmatpush3.bf16.msra.mxu0 %v4239_v27  ;;  %4092 = vmatprep.mubr.msk.f32.mxu0 %vm4606_vm1, %v4607_v26 }
 0x7ba   :  { %4086 = vmatmul.mubr.msk.f32.vlgmr.msra.gmra.mrb[36].mxu1 %vm145_vm0, %v3091_v25  ;;  %4244 = vmatprep.subr.bf16.mxu0 %v4605_v22 }
 0x7bb   :  { %4099 = vmatprep.mubr.msk.f32.mxu1 %vm4606_vm1, %v4607_v26  ;;  %4243 = vmatpush3.bf16.msra.mxu1 %v4242_v36  ;;  %v3505_v36 = vld [vmem:[%s5112_s9 + $0x8] sm:$0xff] }
 0x7bc   :  { %4093 = vmatmul.mubr.msk.f32.vlgmr.msra.gmra.mrb[38].mxu0 %vm145_vm0, %v3091_v25  ;;  %4247 = vmatprep.subr.bf16.mxu1 %v4605_v22 }
 0x7bd   :  { %4106 = vmatprep.mubr.msk.f32.mxu0 %vm4606_vm1, %v4607_v26  ;;  %4246 = vmatpush3.bf16.msra.mxu0 %v4245_v33 }
 0x883   :  { %v2825_v37 = vpop.f32.mrb[32].mxu0  ;;  %v2899_v38 = vpop.f32.mrb[32].mxu1 }
 0x884   :  { %v2830_v40 = vrot.slane %v2825_v37, 2  ;;  %v2904_v41 = vrot.slane %v2899_v38, 2  ;;  %v4052_v43 = vpop.f32.mrb[33].mxu0  ;;  %v4059_v46 = vpop.f32.mrb[33].mxu1  ;;  %v4248_v37 = vpack.c.bf16 %v3505_v36, %v3504_v35  ;;  %v3506_v38 = vld [vmem:[%s5112_s9 + $0x10] sm:$0xff] }
 0x886   :  { %v2832_v47 = vadd.f32 %v2830_v40, %v4848_v31  ;;  %v2906_v48 = vadd.f32 %v2904_v41, %v4850_v34 }
 0x887   :  { %v2973_v49 = vpop.f32.mrb[34].mxu0  ;;  %v3047_v50 = vpop.f32.mrb[34].mxu1 }
 0x888   :  { %v3670_v51 = vmul.f32 -1.442695, %v2832_v47  ;;  %v3671_v52 = vmul.f32 -1.442695, %v2906_v48  ;;  %v3052_v18 = vrot.slane %v3047_v50, 2  ;;  %v4066_v19 = vpop.f32.mrb[35].mxu0 }
 0x889   :  { %v4073_v53 = vpop.f32.mrb[35].mxu1  ;;  %v2978_v56 = vrot.slane %v2973_v49, 2  ;;  %v3687_v47 = vld [vmem:[%s5111_s8] ss:$0 sm:$0xff] }
 0x88a   :  { %4380 = vpow2.f32 %v3670_v51  ;;  %v3054_v61 = vadd.f32 %v3052_v18, %v4854_v42 }
 0x88b   :  { %4382 = vpow2.f32 %v3671_v52  ;;  %v3160_v55 = vpop.f32.mrb[36].mxu0  ;;  %v2980_v1 = vadd.f32 %v2978_v56, %v4852_v39  ;;  %v3688_v52 = vld [vmem:[%s5113_s10] ss:$0 sm:$0xff] }
 0x88c   :  { %v3161_v58 = vadd.f32 %v3673_v54, %v3160_v55  ;;  %v4080_v59 = vpop.f32.mrb[37].mxu0  ;;  %v3672_v4 = vmul.f32 -1.442695, %v3054_v61 }
 0x88d   :  { %v3241_v31 = vpop.f32.mrb[36].mxu1 }
 0x88e   :  { %v3683_v63 = vmul.f32 -1.442695, %v3161_v58  ;;  %v4087_v34 = vpop.f32.mrb[37].mxu1  ;;  %v3242_v42 = vadd.f32 %v3677_v7, %v3241_v31 }
 0x88f   :  { %v3322_v0 = vpop.f32.mrb[38].mxu0 }
 0x890   :  { %4384 = vpow2.f32 %v3683_v63  ;;  %v3323_v2 = vadd.f32 %v3681_v62, %v3322_v0  ;;  %v4094_v3 = vpop.f32.mrb[39].mxu0 }
 0x891   :  { %4386 = vtanh.f32 %v2980_v1 }
 0x892   :  { %v3684_v5 = vmul.f32 -1.442695, %v3323_v2  ;;  %4388 = vpow2.f32 %v3672_v4 }
 0x894   :  { %v4381_v6 = vpop.eup %4380  ;;  %4390 = vpow2.f32 %v3684_v5 }
 0x895   :  { %v4383_v8 = vpop.eup %4382  ;;  %v3058_v44 = vadd.f32 1.0, %v4381_v6 }
 0x896   :  { %v3064_v45 = vadd.f32 1.0, %v4383_v8 }
 0x897   :  { %4392 = vrcp.f32 %v3058_v44 }
 0x898   :  { %4394 = vrcp.f32 %v3064_v45 }
 0x899   :  { %4396 = vtanh.f32 %v3242_v42 }
 0x89a   :  { %v4385_v9 = vpop.eup %4384 }
 0x89b   :  { %v3329_v10 = vadd.f32 1.0, %v4385_v9  ;;  %v4387_v39 = vpop.eup %4386 }
 0x89c   :  { %v4389_v11 = vpop.eup %4388 }
 0x89d   :  { %4398 = vrcp.f32 %v3329_v10  ;;  %v3071_v60 = vadd.f32 1.0, %v4389_v11 }
 0x89e   :  { %v4391_v14 = vpop.eup %4390 }
 0x89f   :  { %v3337_v21 = vadd.f32 1.0, %v4391_v14  ;;  %4400 = vrcp.f32 %v3071_v60 }
 0x8a1   :  { %v4393_v15 = vpop.eup %4392 }
 0x8a2   :  { %v4395_v57 = vpop.eup %4394  ;;  %v3078_v17 = vmul.f32 %v4393_v15, %v4387_v39 }
 0x8a3   :  { %v3077_v20 = vmul.f32 %v4395_v57, %v3075_v16  ;;  %v4397_v23 = vpop.eup %4396 }
 0x8a5   :  { %v3079_v24 = vadd.f32 %v3078_v17, %v3077_v20 }
 0x8a7   :  { %v4399_v28 = vpop.eup %4398  ;;  %4402 = vtanh.f32 %v3079_v24 }
 0x8a8   :  { %4404 = vrcp.f32 %v3337_v21  ;;  %v3333_v29 = vmul.f32 %v4399_v28, %v4397_v23 }
 0x8a9   :  { %v4401_v25 = vpop.eup %4400 }
 0x8aa   :  { %4406 = vtanh.f32 %v3333_v29 }
 0x8b1   :  { %v4403_v27 = vpop.eup %4402 }
 0x8b2   :  { %v4405_v12 = vpop.eup %4404  ;;  %v3081_v30 = vmul.f32 %v4403_v27, %v4401_v25 }
 0x8b4   :  { %v4407_v32 = vpop.eup %4406  ;;  %v3420_v33 = vrot.slane %v3081_v30, 6 }
 0x8b5   :  { %v3341_v13 = vmul.f32 %v4407_v32, %v4405_v12 }
 0x8b6   :  { %4107 = vmatmul.mubr.msk.f32.vlgmr.msra.gmra.mrb[40].mxu0 %vm145_vm0, %v3420_v33 }
 0x8b7   :  { %4100 = vmatmul.mubr.msk.f32.vlgmr.msra.gmra.mrb[38].mxu1 %vm145_vm0, %v3341_v13 }
 0x8b8   :  { %4117 = vmatprep.mubr.msk.f32.mxu1 %vm4606_vm1, %v4607_v26  ;;  %4249 = vmatpush3.bf16.msra.mxu1 %v4248_v37  ;;  %v3507_v26 = vld [vmem:[%s5112_s9 + $0x18] sm:$0xff]  ;;  %s4608_s9 = smov [#allocation14]  }
 0x8b9   :  { %4250 = vmatprep.subr.bf16.mxu1 %v4605_v22  ;;  %v4251_v40 = vpack.c.bf16 %v3507_v26, %v3506_v38  ;;  %s3597_s14 = sshll.u32 %s4608_s9, 4  ;;  %s3598_s14 = int_to_ptr.vmem [resolvable:$true] %s3597_s14 }
 0x8ba   :  { %s4562_s8 = scalar_lea.vmem %s3598_s14, 32  ;;  %p4567_p1 = scmp.lt.s32.totalorder %s3598_s14, %s3598_s14 }
 0x8bb   :  { %p4563_p0 = scmp.ne.s32.totalorder %s3598_s14, %s4562_s8  ;;  %p4568_p2 = scmp.lt.s32.totalorder %s4562_s8, %s4562_s8 }
 0x8bc   :  { %4252 = vmatpush3.bf16.msra.mxu1 %v4251_v40 }
 0x8bd   :  { %p4569_p3 = por %p4568_p2, %p4567_p1 }
 0x8bf   :  { %p4570_p4 = pnand %p4569_p3, %p4563_p0 }
 0x989   :  { %v3489_v41 = vpop.f32.mrb[40].mxu0 }
 0x98a   :  { %v4108_v43 = vpop.f32.mrb[41].mxu0  ;;  %v3415_v46 = vpop.f32.mrb[38].mxu1 }
 0x98b   :  { %v3490_v48 = vadd.f32 %v3489_v41, %v3415_v46  ;;  %v4101_v49 = vpop.f32.mrb[39].mxu1 }
 0x98d   :  { %v3500_v22 = vadd.f32 %v3687_v47, %v3490_v48 }
 0x98f   :  { %vm3501_vm2 = vcmp.gt.f32.partialorder %v3500_v22, 0.0  ;;  %v3502_v50 = vmul.f32 0.01, %v3500_v22 }
 0x991   :  { %v3503_v51 = vsel %vm3501_vm2, %v3500_v22, %v3502_v50 }
 0x992   :  { %4118 = vmatmul.mubr.msk.f32.vlgmr.msra.gmra.mrb[40].mxu1 %vm3515_vm3, %v3503_v51 }
 0xa65   :  { %v3585_v18 = vpop.f32.mrb[40].mxu1 }
 0xa66   :  { %v3586_v19 = vadd.f32 %v3688_v52, %v3585_v18  ;;  %v4119_v53 = vpop.f32.mrb[41].mxu1 }
 0xa68   :  { %3590 = vst.msk [vmem:[#allocation14] sm:$0x3] %vm3589_vm4, %v3586_v19 }
 0xa69   :  { %4573 = shalt.err (!%p4570_p4)
}
 0xa6a   :  { %s4574_s7 = scalar_lea.hbm %s5114_s11, 32 }
 0xa6b   :  { %p4575_p5 = scmp.ne.s32.totalorder %s5114_s11, %s4574_s7  ;;  %p4578_p6 = scmp.lt.u32.totalorder %s4574_s7, %s5114_s11 }
 0xa6d   :  { %p4580_p7 = pnand %p4578_p6, %p4575_p5 }
 0xa6f   :  { %4583 = shalt.err (!%p4580_p7)
}
 0xa70   :  { %3600 = dma.vmem_to_hbm [thread:$0]  %s3598_s14, 32, %s5114_s11, [#allocation4]  }
 0xa71   :  { %4592 = dma.done.wait [#allocation4], 32  }
 0xa72   :  { %4593 = vsyncadd [#allocation4], 4294967264 }
 0xa73   :  { %3604 = vsyncpa [#allocation3], 1 }
 0xa74   :  { %3605 = vsyncpa [#allocation6], 1 }
 0xa75   :  { %3606 = vsyncpa [#allocation9], 1 }
 0xa76   :  { %3607 = vsyncpa [#allocation12], 1 }
 0xa77   :  { %3608 = vsyncpa [#allocation4], 1 }

</bundles_post_ra>
